<compile_context>
chip_gen: v7x
topology: tpu7x:2x2x1
jax: 0.10.0
libtpu: 0.0.40
codegen_flags: <defaults>
</compile_context>

<pallas_src>
import functools

import jax
import jax.numpy as jnp
from jax.experimental import pallas as pl
from jax.experimental.pallas import tpu as pltpu


# ---------------------------------------------------------------------------
# Kernels.  Activations are channel-first tiles: (C, T), T = spatial lanes.
# ---------------------------------------------------------------------------

def _vpu_kernel(xb_ref, xs_ref, w1_ref, w2_ref, bsum_ref, wg_ref, bg_ref,
                out_ref, *, Cb, Cs, F):
    """Small-channel path: weights in SMEM, all compute on the VPU/EUP.

    xb_ref  : (Cb, T) VMEM  conv_below tile        (inp_2 of AttentionGate)
    xs_ref  : (Cs, T) VMEM  skip_connection tile   (inp_1 of AttentionGate)
    w1_ref  : (F, Cs) SMEM  inp_1_conv weight (PyTorch (out, in) layout)
    w2_ref  : (F, Cb) SMEM  inp_2_conv weight
    bsum_ref: (F,)    SMEM  b1 + b2
    wg_ref  : (F,)    SMEM  g-conv weight
    bg_ref  : (1,)    SMEM  g-conv bias
    out_ref : (Cb+Cs, T) VMEM  fused concat: [conv_below | skip * h]
    """
    # Pass-through channels of torch.cat([conv_below, attention], dim=1).
    out_ref[0:Cb, :] = xb_ref[...]

    xs = xs_ref[...].astype(jnp.float32)                     # (Cs, T)
    T = xs.shape[-1]

    # g = bg + sum_j wg[j] * relu(bsum[j] + sum_c w1[j,c]*xs_c + sum_c w2[j,c]*xb_c)
    g = jnp.full((1, T), bg_ref[0], dtype=jnp.float32)
    for j in range(F):                                       # statically unrolled
        acc = jnp.full((1, T), bsum_ref[j], dtype=jnp.float32)
        for c in range(Cs):
            acc = acc + w1_ref[j, c] * xs_ref[c:c + 1, :].astype(jnp.float32)
        for c in range(Cb):
            acc = acc + w2_ref[j, c] * xb_ref[c:c + 1, :].astype(jnp.float32)
        g = g + wg_ref[j] * jnp.maximum(acc, 0.0)

    h = jax.nn.sigmoid(g)                                    # (1, T)
    out_ref[Cb:Cb + Cs, :] = (xs * h).astype(out_ref.dtype)  # broadcast over Cs


def _mxu_kernel(xb_ref, xs_ref, w1_ref, w2_ref, bsum_ref, wg_ref, bg_ref,
                out_ref, *, Cb, Cs, F):
    """Large-channel path: 1x1 convs as channel-first matmuls on the MXU.

    Weights live in VMEM: w1 (F, Cs), w2 (F, Cb), bsum (F, 1), wg (1, F),
    bg (1, 1).  Output layout identical to the VPU path.
    """
    out_ref[0:Cb, :] = xb_ref[...]

    xb = xb_ref[...].astype(jnp.float32)                     # (Cb, T)
    xs = xs_ref[...].astype(jnp.float32)                     # (Cs, T)

    f = (jnp.dot(w1_ref[...], xs, preferred_element_type=jnp.float32)
         + jnp.dot(w2_ref[...], xb, preferred_element_type=jnp.float32)
         + bsum_ref[...])                                    # (F, T)
    f = jnp.maximum(f, 0.0)
    g = jnp.dot(wg_ref[...], f, preferred_element_type=jnp.float32) + bg_ref[...]
    h = jax.nn.sigmoid(g)                                    # (1, T)
    out_ref[Cb:Cb + Cs, :] = (xs * h).astype(out_ref.dtype)


# ---------------------------------------------------------------------------
# Wrapper
# ---------------------------------------------------------------------------

def _round_up(x, m):
    return -(-x // m) * m


def _pick_tile(s_pad, max_tile):
    """Largest multiple of 128 that divides s_pad and is <= max_tile."""
    best = 128
    t = 128
    limit = min(s_pad, max_tile)
    while t <= limit:
        if s_pad % t == 0:
            best = t
        t += 128
    return best


def attention_concat(conv_below, skip_connection, params, *,
                     max_tile=2048, force_path=None):
    """conv_below: (N, Cb, H, W), skip_connection: (N, Cs, H, W)  (NCHW).
    Returns (N, Cb + Cs, H, W) matching PyTorch AttentionConcat.forward."""
    N, Cb, H, W = conv_below.shape
    Ns, Cs, Hs, Ws = skip_connection.shape
    assert (N, H, W) == (Ns, Hs, Ws)
    F = params["w1"].shape[0]
    S = H * W
    out_dtype = jnp.result_type(conv_below.dtype, skip_connection.dtype)

    # NCHW already has spatial last -> reshapes only, no transposes.
    xb = conv_below.reshape(N, Cb, S)
    xs = skip_connection.reshape(N, Cs, S)

    # Lane alignment: pad the spatial axis to a multiple of 128 if needed.
    s_pad = _round_up(S, 128)
    tile = _pick_tile(s_pad, max_tile)
    if s_pad != S:
        xb = jnp.pad(xb, ((0, 0), (0, 0), (0, s_pad - S)))
        xs = jnp.pad(xs, ((0, 0), (0, 0), (0, s_pad - S)))

    grid = (N, s_pad // tile)
    xb_spec = pl.BlockSpec((None, Cb, tile), lambda n, i: (n, 0, i))
    xs_spec = pl.BlockSpec((None, Cs, tile), lambda n, i: (n, 0, i))
    out_spec = pl.BlockSpec((None, Cb + Cs, tile), lambda n, i: (n, 0, i))

    # PyTorch 1x1-conv weights are already (out_ch, in_ch) == channel-first.
    w1 = params["w1"].astype(jnp.float32)                     # (F, Cs)
    w2 = params["w2"].astype(jnp.float32)                     # (F, Cb)
    bsum = (params["b1"] + params["b2"]).astype(jnp.float32)  # (F,)
    wg = params["wg"].astype(jnp.float32)                     # (1, F)
    bg = params["bg"].astype(jnp.float32)                     # (1,)

    if force_path is None:
        use_vpu = F * (Cs + Cb) <= 1024   # unroll budget for the VPU path
    else:
        use_vpu = (force_path == "vpu")

    if use_vpu:
        kernel = functools.partial(_vpu_kernel, Cb=Cb, Cs=Cs, F=F)
        smem = pl.BlockSpec(memory_space=pltpu.MemorySpace.SMEM)
        weight_specs = [smem, smem, smem, smem, smem]
        weight_args = (w1, w2, bsum, wg.reshape(F), bg)
    else:
        kernel = functools.partial(_mxu_kernel, Cb=Cb, Cs=Cs, F=F)
        weight_specs = [
            pl.BlockSpec((F, Cs), lambda n, i: (0, 0)),
            pl.BlockSpec((F, Cb), lambda n, i: (0, 0)),
            pl.BlockSpec((F, 1), lambda n, i: (0, 0)),
            pl.BlockSpec((1, F), lambda n, i: (0, 0)),
            pl.BlockSpec((1, 1), lambda n, i: (0, 0)),
        ]
        weight_args = (w1, w2, bsum.reshape(F, 1), wg, bg.reshape(1, 1))

    out = pl.pallas_call(
        kernel,
        out_shape=jax.ShapeDtypeStruct((N, Cb + Cs, s_pad), out_dtype),
        grid_spec=pltpu.PrefetchScalarGridSpec(
            num_scalar_prefetch=0,
            grid=grid,
            in_specs=[xb_spec, xs_spec] + weight_specs,
            out_specs=out_spec,
        ),
        compiler_params=pltpu.CompilerParams(
            dimension_semantics=("parallel", "parallel")),
    )(xb, xs, *weight_args)

    # Drop lane padding (no-op when S is already a multiple of 128).
    return out[:, :, :S].reshape(N, Cb + Cs, H, W)


# ---------------------------------------------------------------------------
# Params + pure-JAX reference (mirrors the PyTorch forward)
# ---------------------------------------------------------------------------

def init_params(key, conv_below_ch, skip_ch):
    """AttentionGate(inp_1=skip_ch, inp_2=conv_below_ch, inter=conv_below_ch).
    Conv weights in PyTorch (out_ch, in_ch) layout (kernel_size=1)."""
    F = conv_below_ch
    k1, k2, k3, k4, k5, k6 = jax.random.split(key, 6)
    s1 = 1.0 / jnp.sqrt(skip_ch)
    s2 = 1.0 / jnp.sqrt(conv_below_ch)
    sg = 1.0 / jnp.sqrt(F)
    return {
        "w1": jax.random.uniform(k1, (F, skip_ch), jnp.float32, -s1, s1),
        "b1": jax.random.uniform(k2, (F,), jnp.float32, -s1, s1),
        "w2": jax.random.uniform(k3, (F, conv_below_ch), jnp.float32, -s2, s2),
        "b2": jax.random.uniform(k4, (F,), jnp.float32, -s2, s2),
        "wg": jax.random.uniform(k5, (1, F), jnp.float32, -sg, sg),
        "bg": jax.random.uniform(k6, (1,), jnp.float32, -sg, sg),
    }


def _reference(conv_below, skip_connection, p):
    def conv1x1(x, w, b):  # x NCHW, w (O, I), b (O,)
        y = jnp.einsum("nihw,oi->nohw", x, w)
        return y + b[None, :, None, None]
    f = jax.nn.relu(conv1x1(skip_connection, p["w1"], p["b1"])
                    + conv1x1(conv_below, p["w2"], p["b2"]))
    g = conv1x1(f, p["wg"], p["bg"])
    h = jax.nn.sigmoid(g)
    att = skip_connection * h
    return jnp.concatenate([conv_below, att], axis=1)


if __name__ == "__main__":
    key = jax.random.PRNGKey(0)
    k_params, k_below, k_skip = jax.random.split(key, 3)

    N, Cb, Cs, Hh, Ww = 2, 8, 4, 16, 16          # spatial rows = 256 per image
    params = init_params(k_params, conv_below_ch=Cb, skip_ch=Cs)

    conv_below = jax.random.normal(k_below, (N, Cb, Hh, Ww), jnp.float32)
    skip_connection = jax.random.normal(k_skip, (N, Cs, Hh, Ww), jnp.float32)

    run = jax.jit(attention_concat, static_argnames=("max_tile", "force_path"))
    ref = _reference(conv_below, skip_connection, params)

    # Default (small-channel) VPU/SMEM path.
    out = jax.block_until_ready(run(conv_below, skip_connection, params))
    assert out.shape == (N, Cb + Cs, Hh, Ww), out.shape
    assert jnp.allclose(out, ref, atol=1e-5, rtol=1e-5), "VPU path mismatch"

    # MXU fallback path (used automatically for large channel counts).
    out2 = jax.block_until_ready(
        run(conv_below, skip_connection, params, force_path="mxu"))
    assert jnp.allclose(out2, ref, atol=1e-5, rtol=1e-5), "MXU path mismatch"

    print("KERNEL_OK")
</pallas_src>

<mosaic_0001>
module attributes {stable_mosaic.version = 11 : i64} {
  func.func @_vpu_kernel(%arg0: i32, %arg1: i32, %arg2: memref<1x8x256xf32, #tpu.memory_space<vmem>>, %arg3: memref<1x4x256xf32, #tpu.memory_space<vmem>>, %arg4: memref<8x4xf32, #tpu.memory_space<smem>>, %arg5: memref<8x8xf32, #tpu.memory_space<smem>>, %arg6: memref<8xf32, #tpu.memory_space<smem>>, %arg7: memref<8xf32, #tpu.memory_space<smem>>, %arg8: memref<1xf32, #tpu.memory_space<smem>>, %arg9: memref<1x12x256xf32, #tpu.memory_space<vmem>>) attributes {dimension_semantics = [#tpu.dimension_semantics<parallel>, #tpu.dimension_semantics<parallel>], iteration_bounds = array<i64: 2, 1>, scalar_prefetch = 0 : i64, scratch_operands = 0 : i64, tpu.core_type = #tpu.core_type<tc>, window_params = [{transform_indices = @transform_0, window_bounds = array<i64: 1, 8, 256>}, {transform_indices = @transform_1, window_bounds = array<i64: 1, 4, 256>}, {transform_indices = @transform_2, window_bounds = array<i64: 8, 4>}, {transform_indices = @transform_3, window_bounds = array<i64: 8, 8>}, {transform_indices = @transform_4, window_bounds = array<i64: 8>}, {transform_indices = @transform_5, window_bounds = array<i64: 8>}, {transform_indices = @transform_6, window_bounds = array<i64: 1>}, {transform_indices = @transform_7, window_bounds = array<i64: 1, 12, 256>}]} {
    %c0 = arith.constant 0 : index
    %c0_0 = arith.constant 0 : index
    %c0_1 = arith.constant 0 : index
    %0 = vector.load %arg2[%c0, %c0_0, %c0_1] : memref<1x8x256xf32, #tpu.memory_space<vmem>>, vector<1x8x256xf32>
    %1 = vector.shape_cast %0 : vector<1x8x256xf32> to vector<8x256xf32>
    %c0_2 = arith.constant 0 : index
    %c0_3 = arith.constant 0 : index
    %c0_4 = arith.constant 0 : index
    %2 = vector.load %arg9[%c0_2, %c0_3, %c0_4] : memref<1x12x256xf32, #tpu.memory_space<vmem>>, vector<1x8x256xf32>
    %3 = vector.shape_cast %2 : vector<1x8x256xf32> to vector<8x256xf32>
    %4 = vector.shape_cast %1 : vector<8x256xf32> to vector<1x8x256xf32>
    tpu.vector_store %arg9[%c0_2, %c0_3, %c0_4], %4 {strides = array<i32>} : memref<1x12x256xf32, #tpu.memory_space<vmem>>, vector<1x8x256xf32>,
    %c0_5 = arith.constant 0 : index
    %c0_6 = arith.constant 0 : index
    %c0_7 = arith.constant 0 : index
    %5 = vector.load %arg3[%c0_5, %c0_6, %c0_7] : memref<1x4x256xf32, #tpu.memory_space<vmem>>, vector<1x4x256xf32>
    %6 = vector.shape_cast %5 : vector<1x4x256xf32> to vector<4x256xf32>
    %c0_8 = arith.constant 0 : index
    %7 = memref.load %arg8[%c0_8] : memref<1xf32, #tpu.memory_space<smem>>
    %8 = vector.broadcast %7 : f32 to vector<1x256xf32>
    %c0_9 = arith.constant 0 : index
    %9 = memref.load %arg6[%c0_9] : memref<8xf32, #tpu.memory_space<smem>>
    %10 = vector.broadcast %9 : f32 to vector<1x256xf32>
    %c0_10 = arith.constant 0 : index
    %c0_11 = arith.constant 0 : index
    %11 = memref.load %arg4[%c0_10, %c0_11] : memref<8x4xf32, #tpu.memory_space<smem>>
    %c0_12 = arith.constant 0 : index
    %c0_13 = arith.constant 0 : index
    %c0_14 = arith.constant 0 : index
    %12 = vector.load %arg3[%c0_12, %c0_13, %c0_14] : memref<1x4x256xf32, #tpu.memory_space<vmem>>, vector<1x1x256xf32>
    %13 = vector.shape_cast %12 : vector<1x1x256xf32> to vector<1x256xf32>
    %14 = vector.broadcast %11 : f32 to vector<1x256xf32>
    %15 = arith.mulf %14, %13 : vector<1x256xf32>
    %16 = arith.addf %10, %15 : vector<1x256xf32>
    %c0_15 = arith.constant 0 : index
    %c1 = arith.constant 1 : index
    %17 = memref.load %arg4[%c0_15, %c1] : memref<8x4xf32, #tpu.memory_space<smem>>
    %c0_16 = arith.constant 0 : index
    %c1_17 = arith.constant 1 : index
    %c0_18 = arith.constant 0 : index
    %18 = vector.load %arg3[%c0_16, %c1_17, %c0_18] : memref<1x4x256xf32, #tpu.memory_space<vmem>>, vector<1x1x256xf32>
    %19 = vector.shape_cast %18 : vector<1x1x256xf32> to vector<1x256xf32>
    %20 = vector.broadcast %17 : f32 to vector<1x256xf32>
    %21 = arith.mulf %20, %19 : vector<1x256xf32>
    %22 = arith.addf %16, %21 : vector<1x256xf32>
    %c0_19 = arith.constant 0 : index
    %c2 = arith.constant 2 : index
    %23 = memref.load %arg4[%c0_19, %c2] : memref<8x4xf32, #tpu.memory_space<smem>>
    %c0_20 = arith.constant 0 : index
    %c2_21 = arith.constant 2 : index
    %c0_22 = arith.constant 0 : index
    %24 = vector.load %arg3[%c0_20, %c2_21, %c0_22] : memref<1x4x256xf32, #tpu.memory_space<vmem>>, vector<1x1x256xf32>
    %25 = vector.shape_cast %24 : vector<1x1x256xf32> to vector<1x256xf32>
    %26 = vector.broadcast %23 : f32 to vector<1x256xf32>
    %27 = arith.mulf %26, %25 : vector<1x256xf32>
    %28 = arith.addf %22, %27 : vector<1x256xf32>
    %c0_23 = arith.constant 0 : index
    %c3 = arith.constant 3 : index
    %29 = memref.load %arg4[%c0_23, %c3] : memref<8x4xf32, #tpu.memory_space<smem>>
    %c0_24 = arith.constant 0 : index
    %c3_25 = arith.constant 3 : index
    %c0_26 = arith.constant 0 : index
    %30 = vector.load %arg3[%c0_24, %c3_25, %c0_26] : memref<1x4x256xf32, #tpu.memory_space<vmem>>, vector<1x1x256xf32>
    %31 = vector.shape_cast %30 : vector<1x1x256xf32> to vector<1x256xf32>
    %32 = vector.broadcast %29 : f32 to vector<1x256xf32>
    %33 = arith.mulf %32, %31 : vector<1x256xf32>
    %34 = arith.addf %28, %33 : vector<1x256xf32>
    %c0_27 = arith.constant 0 : index
    %c0_28 = arith.constant 0 : index
    %35 = memref.load %arg5[%c0_27, %c0_28] : memref<8x8xf32, #tpu.memory_space<smem>>
    %c0_29 = arith.constant 0 : index
    %c0_30 = arith.constant 0 : index
    %c0_31 = arith.constant 0 : index
    %36 = vector.load %arg2[%c0_29, %c0_30, %c0_31] : memref<1x8x256xf32, #tpu.memory_space<vmem>>, vector<1x1x256xf32>
    %37 = vector.shape_cast %36 : vector<1x1x256xf32> to vector<1x256xf32>
    %38 = vector.broadcast %35 : f32 to vector<1x256xf32>
    %39 = arith.mulf %38, %37 : vector<1x256xf32>
    %40 = arith.addf %34, %39 : vector<1x256xf32>
    %c0_32 = arith.constant 0 : index
    %c1_33 = arith.constant 1 : index
    %41 = memref.load %arg5[%c0_32, %c1_33] : memref<8x8xf32, #tpu.memory_space<smem>>
    %c0_34 = arith.constant 0 : index
    %c1_35 = arith.constant 1 : index
    %c0_36 = arith.constant 0 : index
    %42 = vector.load %arg2[%c0_34, %c1_35, %c0_36] : memref<1x8x256xf32, #tpu.memory_space<vmem>>, vector<1x1x256xf32>
    %43 = vector.shape_cast %42 : vector<1x1x256xf32> to vector<1x256xf32>
    %44 = vector.broadcast %41 : f32 to vector<1x256xf32>
    %45 = arith.mulf %44, %43 : vector<1x256xf32>
    %46 = arith.addf %40, %45 : vector<1x256xf32>
    %c0_37 = arith.constant 0 : index
    %c2_38 = arith.constant 2 : index
    %47 = memref.load %arg5[%c0_37, %c2_38] : memref<8x8xf32, #tpu.memory_space<smem>>
    %c0_39 = arith.constant 0 : index
    %c2_40 = arith.constant 2 : index
    %c0_41 = arith.constant 0 : index
    %48 = vector.load %arg2[%c0_39, %c2_40, %c0_41] : memref<1x8x256xf32, #tpu.memory_space<vmem>>, vector<1x1x256xf32>
    %49 = vector.shape_cast %48 : vector<1x1x256xf32> to vector<1x256xf32>
    %50 = vector.broadcast %47 : f32 to vector<1x256xf32>
    %51 = arith.mulf %50, %49 : vector<1x256xf32>
    %52 = arith.addf %46, %51 : vector<1x256xf32>
    %c0_42 = arith.constant 0 : index
    %c3_43 = arith.constant 3 : index
    %53 = memref.load %arg5[%c0_42, %c3_43] : memref<8x8xf32, #tpu.memory_space<smem>>
    %c0_44 = arith.constant 0 : index
    %c3_45 = arith.constant 3 : index
    %c0_46 = arith.constant 0 : index
    %54 = vector.load %arg2[%c0_44, %c3_45, %c0_46] : memref<1x8x256xf32, #tpu.memory_space<vmem>>, vector<1x1x256xf32>
    %55 = vector.shape_cast %54 : vector<1x1x256xf32> to vector<1x256xf32>
    %56 = vector.broadcast %53 : f32 to vector<1x256xf32>
    %57 = arith.mulf %56, %55 : vector<1x256xf32>
    %58 = arith.addf %52, %57 : vector<1x256xf32>
    %c0_47 = arith.constant 0 : index
    %c4 = arith.constant 4 : index
    %59 = memref.load %arg5[%c0_47, %c4] : memref<8x8xf32, #tpu.memory_space<smem>>
    %c0_48 = arith.constant 0 : index
    %c4_49 = arith.constant 4 : index
    %c0_50 = arith.constant 0 : index
    %60 = vector.load %arg2[%c0_48, %c4_49, %c0_50] : memref<1x8x256xf32, #tpu.memory_space<vmem>>, vector<1x1x256xf32>
    %61 = vector.shape_cast %60 : vector<1x1x256xf32> to vector<1x256xf32>
    %62 = vector.broadcast %59 : f32 to vector<1x256xf32>
    %63 = arith.mulf %62, %61 : vector<1x256xf32>
    %64 = arith.addf %58, %63 : vector<1x256xf32>
    %c0_51 = arith.constant 0 : index
    %c5 = arith.constant 5 : index
    %65 = memref.load %arg5[%c0_51, %c5] : memref<8x8xf32, #tpu.memory_space<smem>>
    %c0_52 = arith.constant 0 : index
    %c5_53 = arith.constant 5 : index
    %c0_54 = arith.constant 0 : index
    %66 = vector.load %arg2[%c0_52, %c5_53, %c0_54] : memref<1x8x256xf32, #tpu.memory_space<vmem>>, vector<1x1x256xf32>
    %67 = vector.shape_cast %66 : vector<1x1x256xf32> to vector<1x256xf32>
    %68 = vector.broadcast %65 : f32 to vector<1x256xf32>
    %69 = arith.mulf %68, %67 : vector<1x256xf32>
    %70 = arith.addf %64, %69 : vector<1x256xf32>
    %c0_55 = arith.constant 0 : index
    %c6 = arith.constant 6 : index
    %71 = memref.load %arg5[%c0_55, %c6] : memref<8x8xf32, #tpu.memory_space<smem>>
    %c0_56 = arith.constant 0 : index
    %c6_57 = arith.constant 6 : index
    %c0_58 = arith.constant 0 : index
    %72 = vector.load %arg2[%c0_56, %c6_57, %c0_58] : memref<1x8x256xf32, #tpu.memory_space<vmem>>, vector<1x1x256xf32>
    %73 = vector.shape_cast %72 : vector<1x1x256xf32> to vector<1x256xf32>
    %74 = vector.broadcast %71 : f32 to vector<1x256xf32>
    %75 = arith.mulf %74, %73 : vector<1x256xf32>
    %76 = arith.addf %70, %75 : vector<1x256xf32>
    %c0_59 = arith.constant 0 : index
    %c7 = arith.constant 7 : index
    %77 = memref.load %arg5[%c0_59, %c7] : memref<8x8xf32, #tpu.memory_space<smem>>
    %c0_60 = arith.constant 0 : index
    %c7_61 = arith.constant 7 : index
    %c0_62 = arith.constant 0 : index
    %78 = vector.load %arg2[%c0_60, %c7_61, %c0_62] : memref<1x8x256xf32, #tpu.memory_space<vmem>>, vector<1x1x256xf32>
    %79 = vector.shape_cast %78 : vector<1x1x256xf32> to vector<1x256xf32>
    %80 = vector.broadcast %77 : f32 to vector<1x256xf32>
    %81 = arith.mulf %80, %79 : vector<1x256xf32>
    %82 = arith.addf %76, %81 : vector<1x256xf32>
    %c0_63 = arith.constant 0 : index
    %83 = memref.load %arg7[%c0_63] : memref<8xf32, #tpu.memory_space<smem>>
    %cst = arith.constant 0.000000e+00 : f32
    %84 = vector.broadcast %cst : f32 to vector<1x256xf32>
    %85 = arith.maximumf %82, %84 : vector<1x256xf32>
    %86 = vector.broadcast %83 : f32 to vector<1x256xf32>
    %87 = arith.mulf %86, %85 : vector<1x256xf32>
    %88 = arith.addf %8, %87 : vector<1x256xf32>
    %c1_64 = arith.constant 1 : index
    %89 = memref.load %arg6[%c1_64] : memref<8xf32, #tpu.memory_space<smem>>
    %90 = vector.broadcast %89 : f32 to vector<1x256xf32>
    %c1_65 = arith.constant 1 : index
    %c0_66 = arith.constant 0 : index
    %91 = memref.load %arg4[%c1_65, %c0_66] : memref<8x4xf32, #tpu.memory_space<smem>>
    %c0_67 = arith.constant 0 : index
    %c0_68 = arith.constant 0 : index
    %c0_69 = arith.constant 0 : index
    %92 = vector.load %arg3[%c0_67, %c0_68, %c0_69] : memref<1x4x256xf32, #tpu.memory_space<vmem>>, vector<1x1x256xf32>
    %93 = vector.shape_cast %92 : vector<1x1x256xf32> to vector<1x256xf32>
    %94 = vector.broadcast %91 : f32 to vector<1x256xf32>
    %95 = arith.mulf %94, %93 : vector<1x256xf32>
    %96 = arith.addf %90, %95 : vector<1x256xf32>
    %c1_70 = arith.constant 1 : index
    %c1_71 = arith.constant 1 : index
    %97 = memref.load %arg4[%c1_70, %c1_71] : memref<8x4xf32, #tpu.memory_space<smem>>
    %c0_72 = arith.constant 0 : index
    %c1_73 = arith.constant 1 : index
    %c0_74 = arith.constant 0 : index
    %98 = vector.load %arg3[%c0_72, %c1_73, %c0_74] : memref<1x4x256xf32, #tpu.memory_space<vmem>>, vector<1x1x256xf32>
    %99 = vector.shape_cast %98 : vector<1x1x256xf32> to vector<1x256xf32>
    %100 = vector.broadcast %97 : f32 to vector<1x256xf32>
    %101 = arith.mulf %100, %99 : vector<1x256xf32>
    %102 = arith.addf %96, %101 : vector<1x256xf32>
    %c1_75 = arith.constant 1 : index
    %c2_76 = arith.constant 2 : index
    %103 = memref.load %arg4[%c1_75, %c2_76] : memref<8x4xf32, #tpu.memory_space<smem>>
    %c0_77 = arith.constant 0 : index
    %c2_78 = arith.constant 2 : index
    %c0_79 = arith.constant 0 : index
    %104 = vector.load %arg3[%c0_77, %c2_78, %c0_79] : memref<1x4x256xf32, #tpu.memory_space<vmem>>, vector<1x1x256xf32>
    %105 = vector.shape_cast %104 : vector<1x1x256xf32> to vector<1x256xf32>
    %106 = vector.broadcast %103 : f32 to vector<1x256xf32>
    %107 = arith.mulf %106, %105 : vector<1x256xf32>
    %108 = arith.addf %102, %107 : vector<1x256xf32>
    %c1_80 = arith.constant 1 : index
    %c3_81 = arith.constant 3 : index
    %109 = memref.load %arg4[%c1_80, %c3_81] : memref<8x4xf32, #tpu.memory_space<smem>>
    %c0_82 = arith.constant 0 : index
    %c3_83 = arith.constant 3 : index
    %c0_84 = arith.constant 0 : index
    %110 = vector.load %arg3[%c0_82, %c3_83, %c0_84] : memref<1x4x256xf32, #tpu.memory_space<vmem>>, vector<1x1x256xf32>
    %111 = vector.shape_cast %110 : vector<1x1x256xf32> to vector<1x256xf32>
    %112 = vector.broadcast %109 : f32 to vector<1x256xf32>
    %113 = arith.mulf %112, %111 : vector<1x256xf32>
    %114 = arith.addf %108, %113 : vector<1x256xf32>
    %c1_85 = arith.constant 1 : index
    %c0_86 = arith.constant 0 : index
    %115 = memref.load %arg5[%c1_85, %c0_86] : memref<8x8xf32, #tpu.memory_space<smem>>
    %c0_87 = arith.constant 0 : index
    %c0_88 = arith.constant 0 : index
    %c0_89 = arith.constant 0 : index
    %116 = vector.load %arg2[%c0_87, %c0_88, %c0_89] : memref<1x8x256xf32, #tpu.memory_space<vmem>>, vector<1x1x256xf32>
    %117 = vector.shape_cast %116 : vector<1x1x256xf32> to vector<1x256xf32>
    %118 = vector.broadcast %115 : f32 to vector<1x256xf32>
    %119 = arith.mulf %118, %117 : vector<1x256xf32>
    %120 = arith.addf %114, %119 : vector<1x256xf32>
    %c1_90 = arith.constant 1 : index
    %c1_91 = arith.constant 1 : index
    %121 = memref.load %arg5[%c1_90, %c1_91] : memref<8x8xf32, #tpu.memory_space<smem>>
    %c0_92 = arith.constant 0 : index
    %c1_93 = arith.constant 1 : index
    %c0_94 = arith.constant 0 : index
    %122 = vector.load %arg2[%c0_92, %c1_93, %c0_94] : memref<1x8x256xf32, #tpu.memory_space<vmem>>, vector<1x1x256xf32>
    %123 = vector.shape_cast %122 : vector<1x1x256xf32> to vector<1x256xf32>
    %124 = vector.broadcast %121 : f32 to vector<1x256xf32>
    %125 = arith.mulf %124, %123 : vector<1x256xf32>
    %126 = arith.addf %120, %125 : vector<1x256xf32>
    %c1_95 = arith.constant 1 : index
    %c2_96 = arith.constant 2 : index
    %127 = memref.load %arg5[%c1_95, %c2_96] : memref<8x8xf32, #tpu.memory_space<smem>>
    %c0_97 = arith.constant 0 : index
    %c2_98 = arith.constant 2 : index
    %c0_99 = arith.constant 0 : index
    %128 = vector.load %arg2[%c0_97, %c2_98, %c0_99] : memref<1x8x256xf32, #tpu.memory_space<vmem>>, vector<1x1x256xf32>
    %129 = vector.shape_cast %128 : vector<1x1x256xf32> to vector<1x256xf32>
    %130 = vector.broadcast %127 : f32 to vector<1x256xf32>
    %131 = arith.mulf %130, %129 : vector<1x256xf32>
    %132 = arith.addf %126, %131 : vector<1x256xf32>
    %c1_100 = arith.constant 1 : index
    %c3_101 = arith.constant 3 : index
    %133 = memref.load %arg5[%c1_100, %c3_101] : memref<8x8xf32, #tpu.memory_space<smem>>
    %c0_102 = arith.constant 0 : index
    %c3_103 = arith.constant 3 : index
    %c0_104 = arith.constant 0 : index
    %134 = vector.load %arg2[%c0_102, %c3_103, %c0_104] : memref<1x8x256xf32, #tpu.memory_space<vmem>>, vector<1x1x256xf32>
    %135 = vector.shape_cast %134 : vector<1x1x256xf32> to vector<1x256xf32>
    %136 = vector.broadcast %133 : f32 to vector<1x256xf32>
    %137 = arith.mulf %136, %135 : vector<1x256xf32>
    %138 = arith.addf %132, %137 : vector<1x256xf32>
    %c1_105 = arith.constant 1 : index
    %c4_106 = arith.constant 4 : index
    %139 = memref.load %arg5[%c1_105, %c4_106] : memref<8x8xf32, #tpu.memory_space<smem>>
    %c0_107 = arith.constant 0 : index
    %c4_108 = arith.constant 4 : index
    %c0_109 = arith.constant 0 : index
    %140 = vector.load %arg2[%c0_107, %c4_108, %c0_109] : memref<1x8x256xf32, #tpu.memory_space<vmem>>, vector<1x1x256xf32>
    %141 = vector.shape_cast %140 : vector<1x1x256xf32> to vector<1x256xf32>
    %142 = vector.broadcast %139 : f32 to vector<1x256xf32>
    %143 = arith.mulf %142, %141 : vector<1x256xf32>
    %144 = arith.addf %138, %143 : vector<1x256xf32>
    %c1_110 = arith.constant 1 : index
    %c5_111 = arith.constant 5 : index
    %145 = memref.load %arg5[%c1_110, %c5_111] : memref<8x8xf32, #tpu.memory_space<smem>>
    %c0_112 = arith.constant 0 : index
    %c5_113 = arith.constant 5 : index
    %c0_114 = arith.constant 0 : index
    %146 = vector.load %arg2[%c0_112, %c5_113, %c0_114] : memref<1x8x256xf32, #tpu.memory_space<vmem>>, vector<1x1x256xf32>
    %147 = vector.shape_cast %146 : vector<1x1x256xf32> to vector<1x256xf32>
    %148 = vector.broadcast %145 : f32 to vector<1x256xf32>
    %149 = arith.mulf %148, %147 : vector<1x256xf32>
    %150 = arith.addf %144, %149 : vector<1x256xf32>
    %c1_115 = arith.constant 1 : index
    %c6_116 = arith.constant 6 : index
    %151 = memref.load %arg5[%c1_115, %c6_116] : memref<8x8xf32, #tpu.memory_space<smem>>
    %c0_117 = arith.constant 0 : index
    %c6_118 = arith.constant 6 : index
    %c0_119 = arith.constant 0 : index
    %152 = vector.load %arg2[%c0_117, %c6_118, %c0_119] : memref<1x8x256xf32, #tpu.memory_space<vmem>>, vector<1x1x256xf32>
    %153 = vector.shape_cast %152 : vector<1x1x256xf32> to vector<1x256xf32>
    %154 = vector.broadcast %151 : f32 to vector<1x256xf32>
    %155 = arith.mulf %154, %153 : vector<1x256xf32>
    %156 = arith.addf %150, %155 : vector<1x256xf32>
    %c1_120 = arith.constant 1 : index
    %c7_121 = arith.constant 7 : index
    %157 = memref.load %arg5[%c1_120, %c7_121] : memref<8x8xf32, #tpu.memory_space<smem>>
    %c0_122 = arith.constant 0 : index
    %c7_123 = arith.constant 7 : index
    %c0_124 = arith.constant 0 : index
    %158 = vector.load %arg2[%c0_122, %c7_123, %c0_124] : memref<1x8x256xf32, #tpu.memory_space<vmem>>, vector<1x1x256xf32>
    %159 = vector.shape_cast %158 : vector<1x1x256xf32> to vector<1x256xf32>
    %160 = vector.broadcast %157 : f32 to vector<1x256xf32>
    %161 = arith.mulf %160, %159 : vector<1x256xf32>
    %162 = arith.addf %156, %161 : vector<1x256xf32>
    %c1_125 = arith.constant 1 : index
    %163 = memref.load %arg7[%c1_125] : memref<8xf32, #tpu.memory_space<smem>>
    %cst_126 = arith.constant 0.000000e+00 : f32
    %164 = vector.broadcast %cst_126 : f32 to vector<1x256xf32>
    %165 = arith.maximumf %162, %164 : vector<1x256xf32>
    %166 = vector.broadcast %163 : f32 to vector<1x256xf32>
    %167 = arith.mulf %166, %165 : vector<1x256xf32>
    %168 = arith.addf %88, %167 : vector<1x256xf32>
    %c2_127 = arith.constant 2 : index
    %169 = memref.load %arg6[%c2_127] : memref<8xf32, #tpu.memory_space<smem>>
    %170 = vector.broadcast %169 : f32 to vector<1x256xf32>
    %c2_128 = arith.constant 2 : index
    %c0_129 = arith.constant 0 : index
    %171 = memref.load %arg4[%c2_128, %c0_129] : memref<8x4xf32, #tpu.memory_space<smem>>
    %c0_130 = arith.constant 0 : index
    %c0_131 = arith.constant 0 : index
    %c0_132 = arith.constant 0 : index
    %172 = vector.load %arg3[%c0_130, %c0_131, %c0_132] : memref<1x4x256xf32, #tpu.memory_space<vmem>>, vector<1x1x256xf32>
    %173 = vector.shape_cast %172 : vector<1x1x256xf32> to vector<1x256xf32>
    %174 = vector.broadcast %171 : f32 to vector<1x256xf32>
    %175 = arith.mulf %174, %173 : vector<1x256xf32>
    %176 = arith.addf %170, %175 : vector<1x256xf32>
    %c2_133 = arith.constant 2 : index
    %c1_134 = arith.constant 1 : index
    %177 = memref.load %arg4[%c2_133, %c1_134] : memref<8x4xf32, #tpu.memory_space<smem>>
    %c0_135 = arith.constant 0 : index
    %c1_136 = arith.constant 1 : index
    %c0_137 = arith.constant 0 : index
    %178 = vector.load %arg3[%c0_135, %c1_136, %c0_137] : memref<1x4x256xf32, #tpu.memory_space<vmem>>, vector<1x1x256xf32>
    %179 = vector.shape_cast %178 : vector<1x1x256xf32> to vector<1x256xf32>
    %180 = vector.broadcast %177 : f32 to vector<1x256xf32>
    %181 = arith.mulf %180, %179 : vector<1x256xf32>
    %182 = arith.addf %176, %181 : vector<1x256xf32>
    %c2_138 = arith.constant 2 : index
    %c2_139 = arith.constant 2 : index
    %183 = memref.load %arg4[%c2_138, %c2_139] : memref<8x4xf32, #tpu.memory_space<smem>>
    %c0_140 = arith.constant 0 : index
    %c2_141 = arith.constant 2 : index
    %c0_142 = arith.constant 0 : index
    %184 = vector.load %arg3[%c0_140, %c2_141, %c0_142] : memref<1x4x256xf32, #tpu.memory_space<vmem>>, vector<1x1x256xf32>
    %185 = vector.shape_cast %184 : vector<1x1x256xf32> to vector<1x256xf32>
    %186 = vector.broadcast %183 : f32 to vector<1x256xf32>
    %187 = arith.mulf %186, %185 : vector<1x256xf32>
    %188 = arith.addf %182, %187 : vector<1x256xf32>
    %c2_143 = arith.constant 2 : index
    %c3_144 = arith.constant 3 : index
    %189 = memref.load %arg4[%c2_143, %c3_144] : memref<8x4xf32, #tpu.memory_space<smem>>
    %c0_145 = arith.constant 0 : index
    %c3_146 = arith.constant 3 : index
    %c0_147 = arith.constant 0 : index
    %190 = vector.load %arg3[%c0_145, %c3_146, %c0_147] : memref<1x4x256xf32, #tpu.memory_space<vmem>>, vector<1x1x256xf32>
    %191 = vector.shape_cast %190 : vector<1x1x256xf32> to vector<1x256xf32>
    %192 = vector.broadcast %189 : f32 to vector<1x256xf32>
    %193 = arith.mulf %192, %191 : vector<1x256xf32>
    %194 = arith.addf %188, %193 : vector<1x256xf32>
    %c2_148 = arith.constant 2 : index
    %c0_149 = arith.constant 0 : index
    %195 = memref.load %arg5[%c2_148, %c0_149] : memref<8x8xf32, #tpu.memory_space<smem>>
    %c0_150 = arith.constant 0 : index
    %c0_151 = arith.constant 0 : index
    %c0_152 = arith.constant 0 : index
    %196 = vector.load %arg2[%c0_150, %c0_151, %c0_152] : memref<1x8x256xf32, #tpu.memory_space<vmem>>, vector<1x1x256xf32>
    %197 = vector.shape_cast %196 : vector<1x1x256xf32> to vector<1x256xf32>
    %198 = vector.broadcast %195 : f32 to vector<1x256xf32>
    %199 = arith.mulf %198, %197 : vector<1x256xf32>
    %200 = arith.addf %194, %199 : vector<1x256xf32>
    %c2_153 = arith.constant 2 : index
    %c1_154 = arith.constant 1 : index
    %201 = memref.load %arg5[%c2_153, %c1_154] : memref<8x8xf32, #tpu.memory_space<smem>>
    %c0_155 = arith.constant 0 : index
    %c1_156 = arith.constant 1 : index
    %c0_157 = arith.constant 0 : index
    %202 = vector.load %arg2[%c0_155, %c1_156, %c0_157] : memref<1x8x256xf32, #tpu.memory_space<vmem>>, vector<1x1x256xf32>
    %203 = vector.shape_cast %202 : vector<1x1x256xf32> to vector<1x256xf32>
    %204 = vector.broadcast %201 : f32 to vector<1x256xf32>
    %205 = arith.mulf %204, %203 : vector<1x256xf32>
    %206 = arith.addf %200, %205 : vector<1x256xf32>
    %c2_158 = arith.constant 2 : index
    %c2_159 = arith.constant 2 : index
    %207 = memref.load %arg5[%c2_158, %c2_159] : memref<8x8xf32, #tpu.memory_space<smem>>
    %c0_160 = arith.constant 0 : index
    %c2_161 = arith.constant 2 : index
    %c0_162 = arith.constant 0 : index
    %208 = vector.load %arg2[%c0_160, %c2_161, %c0_162] : memref<1x8x256xf32, #tpu.memory_space<vmem>>, vector<1x1x256xf32>
    %209 = vector.shape_cast %208 : vector<1x1x256xf32> to vector<1x256xf32>
    %210 = vector.broadcast %207 : f32 to vector<1x256xf32>
    %211 = arith.mulf %210, %209 : vector<1x256xf32>
    %212 = arith.addf %206, %211 : vector<1x256xf32>
    %c2_163 = arith.constant 2 : index
    %c3_164 = arith.constant 3 : index
    %213 = memref.load %arg5[%c2_163, %c3_164] : memref<8x8xf32, #tpu.memory_space<smem>>
    %c0_165 = arith.constant 0 : index
    %c3_166 = arith.constant 3 : index
    %c0_167 = arith.constant 0 : index
    %214 = vector.load %arg2[%c0_165, %c3_166, %c0_167] : memref<1x8x256xf32, #tpu.memory_space<vmem>>, vector<1x1x256xf32>
    %215 = vector.shape_cast %214 : vector<1x1x256xf32> to vector<1x256xf32>
    %216 = vector.broadcast %213 : f32 to vector<1x256xf32>
    %217 = arith.mulf %216, %215 : vector<1x256xf32>
    %218 = arith.addf %212, %217 : vector<1x256xf32>
    %c2_168 = arith.constant 2 : index
    %c4_169 = arith.constant 4 : index
    %219 = memref.load %arg5[%c2_168, %c4_169] : memref<8x8xf32, #tpu.memory_space<smem>>
    %c0_170 = arith.constant 0 : index
    %c4_171 = arith.constant 4 : index
    %c0_172 = arith.constant 0 : index
    %220 = vector.load %arg2[%c0_170, %c4_171, %c0_172] : memref<1x8x256xf32, #tpu.memory_space<vmem>>, vector<1x1x256xf32>
    %221 = vector.shape_cast %220 : vector<1x1x256xf32> to vector<1x256xf32>
    %222 = vector.broadcast %219 : f32 to vector<1x256xf32>
    %223 = arith.mulf %222, %221 : vector<1x256xf32>
    %224 = arith.addf %218, %223 : vector<1x256xf32>
    %c2_173 = arith.constant 2 : index
    %c5_174 = arith.constant 5 : index
    %225 = memref.load %arg5[%c2_173, %c5_174] : memref<8x8xf32, #tpu.memory_space<smem>>
    %c0_175 = arith.constant 0 : index
    %c5_176 = arith.constant 5 : index
    %c0_177 = arith.constant 0 : index
    %226 = vector.load %arg2[%c0_175, %c5_176, %c0_177] : memref<1x8x256xf32, #tpu.memory_space<vmem>>, vector<1x1x256xf32>
    %227 = vector.shape_cast %226 : vector<1x1x256xf32> to vector<1x256xf32>
    %228 = vector.broadcast %225 : f32 to vector<1x256xf32>
    %229 = arith.mulf %228, %227 : vector<1x256xf32>
    %230 = arith.addf %224, %229 : vector<1x256xf32>
    %c2_178 = arith.constant 2 : index
    %c6_179 = arith.constant 6 : index
    %231 = memref.load %arg5[%c2_178, %c6_179] : memref<8x8xf32, #tpu.memory_space<smem>>
    %c0_180 = arith.constant 0 : index
    %c6_181 = arith.constant 6 : index
    %c0_182 = arith.constant 0 : index
    %232 = vector.load %arg2[%c0_180, %c6_181, %c0_182] : memref<1x8x256xf32, #tpu.memory_space<vmem>>, vector<1x1x256xf32>
    %233 = vector.shape_cast %232 : vector<1x1x256xf32> to vector<1x256xf32>
    %234 = vector.broadcast %231 : f32 to vector<1x256xf32>
    %235 = arith.mulf %234, %233 : vector<1x256xf32>
    %236 = arith.addf %230, %235 : vector<1x256xf32>
    %c2_183 = arith.constant 2 : index
    %c7_184 = arith.constant 7 : index
    %237 = memref.load %arg5[%c2_183, %c7_184] : memref<8x8xf32, #tpu.memory_space<smem>>
    %c0_185 = arith.constant 0 : index
    %c7_186 = arith.constant 7 : index
    %c0_187 = arith.constant 0 : index
    %238 = vector.load %arg2[%c0_185, %c7_186, %c0_187] : memref<1x8x256xf32, #tpu.memory_space<vmem>>, vector<1x1x256xf32>
    %239 = vector.shape_cast %238 : vector<1x1x256xf32> to vector<1x256xf32>
    %240 = vector.broadcast %237 : f32 to vector<1x256xf32>
    %241 = arith.mulf %240, %239 : vector<1x256xf32>
    %242 = arith.addf %236, %241 : vector<1x256xf32>
    %c2_188 = arith.constant 2 : index
    %243 = memref.load %arg7[%c2_188] : memref<8xf32, #tpu.memory_space<smem>>
    %cst_189 = arith.constant 0.000000e+00 : f32
    %244 = vector.broadcast %cst_189 : f32 to vector<1x256xf32>
    %245 = arith.maximumf %242, %244 : vector<1x256xf32>
    %246 = vector.broadcast %243 : f32 to vector<1x256xf32>
    %247 = arith.mulf %246, %245 : vector<1x256xf32>
    %248 = arith.addf %168, %247 : vector<1x256xf32>
    %c3_190 = arith.constant 3 : index
    %249 = memref.load %arg6[%c3_190] : memref<8xf32, #tpu.memory_space<smem>>
    %250 = vector.broadcast %249 : f32 to vector<1x256xf32>
    %c3_191 = arith.constant 3 : index
    %c0_192 = arith.constant 0 : index
    %251 = memref.load %arg4[%c3_191, %c0_192] : memref<8x4xf32, #tpu.memory_space<smem>>
    %c0_193 = arith.constant 0 : index
    %c0_194 = arith.constant 0 : index
    %c0_195 = arith.constant 0 : index
    %252 = vector.load %arg3[%c0_193, %c0_194, %c0_195] : memref<1x4x256xf32, #tpu.memory_space<vmem>>, vector<1x1x256xf32>
    %253 = vector.shape_cast %252 : vector<1x1x256xf32> to vector<1x256xf32>
    %254 = vector.broadcast %251 : f32 to vector<1x256xf32>
    %255 = arith.mulf %254, %253 : vector<1x256xf32>
    %256 = arith.addf %250, %255 : vector<1x256xf32>
    %c3_196 = arith.constant 3 : index
    %c1_197 = arith.constant 1 : index
    %257 = memref.load %arg4[%c3_196, %c1_197] : memref<8x4xf32, #tpu.memory_space<smem>>
    %c0_198 = arith.constant 0 : index
    %c1_199 = arith.constant 1 : index
    %c0_200 = arith.constant 0 : index
    %258 = vector.load %arg3[%c0_198, %c1_199, %c0_200] : memref<1x4x256xf32, #tpu.memory_space<vmem>>, vector<1x1x256xf32>
    %259 = vector.shape_cast %258 : vector<1x1x256xf32> to vector<1x256xf32>
    %260 = vector.broadcast %257 : f32 to vector<1x256xf32>
    %261 = arith.mulf %260, %259 : vector<1x256xf32>
    %262 = arith.addf %256, %261 : vector<1x256xf32>
    %c3_201 = arith.constant 3 : index
    %c2_202 = arith.constant 2 : index
    %263 = memref.load %arg4[%c3_201, %c2_202] : memref<8x4xf32, #tpu.memory_space<smem>>
    %c0_203 = arith.constant 0 : index
    %c2_204 = arith.constant 2 : index
    %c0_205 = arith.constant 0 : index
    %264 = vector.load %arg3[%c0_203, %c2_204, %c0_205] : memref<1x4x256xf32, #tpu.memory_space<vmem>>, vector<1x1x256xf32>
    %265 = vector.shape_cast %264 : vector<1x1x256xf32> to vector<1x256xf32>
    %266 = vector.broadcast %263 : f32 to vector<1x256xf32>
    %267 = arith.mulf %266, %265 : vector<1x256xf32>
    %268 = arith.addf %262, %267 : vector<1x256xf32>
    %c3_206 = arith.constant 3 : index
    %c3_207 = arith.constant 3 : index
    %269 = memref.load %arg4[%c3_206, %c3_207] : memref<8x4xf32, #tpu.memory_space<smem>>
    %c0_208 = arith.constant 0 : index
    %c3_209 = arith.constant 3 : index
    %c0_210 = arith.constant 0 : index
    %270 = vector.load %arg3[%c0_208, %c3_209, %c0_210] : memref<1x4x256xf32, #tpu.memory_space<vmem>>, vector<1x1x256xf32>
    %271 = vector.shape_cast %270 : vector<1x1x256xf32> to vector<1x256xf32>
    %272 = vector.broadcast %269 : f32 to vector<1x256xf32>
    %273 = arith.mulf %272, %271 : vector<1x256xf32>
    %274 = arith.addf %268, %273 : vector<1x256xf32>
    %c3_211 = arith.constant 3 : index
    %c0_212 = arith.constant 0 : index
    %275 = memref.load %arg5[%c3_211, %c0_212] : memref<8x8xf32, #tpu.memory_space<smem>>
    %c0_213 = arith.constant 0 : index
    %c0_214 = arith.constant 0 : index
    %c0_215 = arith.constant 0 : index
    %276 = vector.load %arg2[%c0_213, %c0_214, %c0_215] : memref<1x8x256xf32, #tpu.memory_space<vmem>>, vector<1x1x256xf32>
    %277 = vector.shape_cast %276 : vector<1x1x256xf32> to vector<1x256xf32>
    %278 = vector.broadcast %275 : f32 to vector<1x256xf32>
    %279 = arith.mulf %278, %277 : vector<1x256xf32>
    %280 = arith.addf %274, %279 : vector<1x256xf32>
    %c3_216 = arith.constant 3 : index
    %c1_217 = arith.constant 1 : index
    %281 = memref.load %arg5[%c3_216, %c1_217] : memref<8x8xf32, #tpu.memory_space<smem>>
    %c0_218 = arith.constant 0 : index
    %c1_219 = arith.constant 1 : index
    %c0_220 = arith.constant 0 : index
    %282 = vector.load %arg2[%c0_218, %c1_219, %c0_220] : memref<1x8x256xf32, #tpu.memory_space<vmem>>, vector<1x1x256xf32>
    %283 = vector.shape_cast %282 : vector<1x1x256xf32> to vector<1x256xf32>
    %284 = vector.broadcast %281 : f32 to vector<1x256xf32>
    %285 = arith.mulf %284, %283 : vector<1x256xf32>
    %286 = arith.addf %280, %285 : vector<1x256xf32>
    %c3_221 = arith.constant 3 : index
    %c2_222 = arith.constant 2 : index
    %287 = memref.load %arg5[%c3_221, %c2_222] : memref<8x8xf32, #tpu.memory_space<smem>>
    %c0_223 = arith.constant 0 : index
    %c2_224 = arith.constant 2 : index
    %c0_225 = arith.constant 0 : index
    %288 = vector.load %arg2[%c0_223, %c2_224, %c0_225] : memref<1x8x256xf32, #tpu.memory_space<vmem>>, vector<1x1x256xf32>
    %289 = vector.shape_cast %288 : vector<1x1x256xf32> to vector<1x256xf32>
    %290 = vector.broadcast %287 : f32 to vector<1x256xf32>
    %291 = arith.mulf %290, %289 : vector<1x256xf32>
    %292 = arith.addf %286, %291 : vector<1x256xf32>
    %c3_226 = arith.constant 3 : index
    %c3_227 = arith.constant 3 : index
    %293 = memref.load %arg5[%c3_226, %c3_227] : memref<8x8xf32, #tpu.memory_space<smem>>
    %c0_228 = arith.constant 0 : index
    %c3_229 = arith.constant 3 : index
    %c0_230 = arith.constant 0 : index
    %294 = vector.load %arg2[%c0_228, %c3_229, %c0_230] : memref<1x8x256xf32, #tpu.memory_space<vmem>>, vector<1x1x256xf32>
    %295 = vector.shape_cast %294 : vector<1x1x256xf32> to vector<1x256xf32>
    %296 = vector.broadcast %293 : f32 to vector<1x256xf32>
    %297 = arith.mulf %296, %295 : vector<1x256xf32>
    %298 = arith.addf %292, %297 : vector<1x256xf32>
    %c3_231 = arith.constant 3 : index
    %c4_232 = arith.constant 4 : index
    %299 = memref.load %arg5[%c3_231, %c4_232] : memref<8x8xf32, #tpu.memory_space<smem>>
    %c0_233 = arith.constant 0 : index
    %c4_234 = arith.constant 4 : index
    %c0_235 = arith.constant 0 : index
    %300 = vector.load %arg2[%c0_233, %c4_234, %c0_235] : memref<1x8x256xf32, #tpu.memory_space<vmem>>, vector<1x1x256xf32>
    %301 = vector.shape_cast %300 : vector<1x1x256xf32> to vector<1x256xf32>
    %302 = vector.broadcast %299 : f32 to vector<1x256xf32>
    %303 = arith.mulf %302, %301 : vector<1x256xf32>
    %304 = arith.addf %298, %303 : vector<1x256xf32>
    %c3_236 = arith.constant 3 : index
    %c5_237 = arith.constant 5 : index
    %305 = memref.load %arg5[%c3_236, %c5_237] : memref<8x8xf32, #tpu.memory_space<smem>>
    %c0_238 = arith.constant 0 : index
    %c5_239 = arith.constant 5 : index
    %c0_240 = arith.constant 0 : index
    %306 = vector.load %arg2[%c0_238, %c5_239, %c0_240] : memref<1x8x256xf32, #tpu.memory_space<vmem>>, vector<1x1x256xf32>
    %307 = vector.shape_cast %306 : vector<1x1x256xf32> to vector<1x256xf32>
    %308 = vector.broadcast %305 : f32 to vector<1x256xf32>
    %309 = arith.mulf %308, %307 : vector<1x256xf32>
    %310 = arith.addf %304, %309 : vector<1x256xf32>
    %c3_241 = arith.constant 3 : index
    %c6_242 = arith.constant 6 : index
    %311 = memref.load %arg5[%c3_241, %c6_242] : memref<8x8xf32, #tpu.memory_space<smem>>
    %c0_243 = arith.constant 0 : index
    %c6_244 = arith.constant 6 : index
    %c0_245 = arith.constant 0 : index
    %312 = vector.load %arg2[%c0_243, %c6_244, %c0_245] : memref<1x8x256xf32, #tpu.memory_space<vmem>>, vector<1x1x256xf32>
    %313 = vector.shape_cast %312 : vector<1x1x256xf32> to vector<1x256xf32>
    %314 = vector.broadcast %311 : f32 to vector<1x256xf32>
    %315 = arith.mulf %314, %313 : vector<1x256xf32>
    %316 = arith.addf %310, %315 : vector<1x256xf32>
    %c3_246 = arith.constant 3 : index
    %c7_247 = arith.constant 7 : index
    %317 = memref.load %arg5[%c3_246, %c7_247] : memref<8x8xf32, #tpu.memory_space<smem>>
    %c0_248 = arith.constant 0 : index
    %c7_249 = arith.constant 7 : index
    %c0_250 = arith.constant 0 : index
    %318 = vector.load %arg2[%c0_248, %c7_249, %c0_250] : memref<1x8x256xf32, #tpu.memory_space<vmem>>, vector<1x1x256xf32>
    %319 = vector.shape_cast %318 : vector<1x1x256xf32> to vector<1x256xf32>
    %320 = vector.broadcast %317 : f32 to vector<1x256xf32>
    %321 = arith.mulf %320, %319 : vector<1x256xf32>
    %322 = arith.addf %316, %321 : vector<1x256xf32>
    %c3_251 = arith.constant 3 : index
    %323 = memref.load %arg7[%c3_251] : memref<8xf32, #tpu.memory_space<smem>>
    %cst_252 = arith.constant 0.000000e+00 : f32
    %324 = vector.broadcast %cst_252 : f32 to vector<1x256xf32>
    %325 = arith.maximumf %322, %324 : vector<1x256xf32>
    %326 = vector.broadcast %323 : f32 to vector<1x256xf32>
    %327 = arith.mulf %326, %325 : vector<1x256xf32>
    %328 = arith.addf %248, %327 : vector<1x256xf32>
    %c4_253 = arith.constant 4 : index
    %329 = memref.load %arg6[%c4_253] : memref<8xf32, #tpu.memory_space<smem>>
    %330 = vector.broadcast %329 : f32 to vector<1x256xf32>
    %c4_254 = arith.constant 4 : index
    %c0_255 = arith.constant 0 : index
    %331 = memref.load %arg4[%c4_254, %c0_255] : memref<8x4xf32, #tpu.memory_space<smem>>
    %c0_256 = arith.constant 0 : index
    %c0_257 = arith.constant 0 : index
    %c0_258 = arith.constant 0 : index
    %332 = vector.load %arg3[%c0_256, %c0_257, %c0_258] : memref<1x4x256xf32, #tpu.memory_space<vmem>>, vector<1x1x256xf32>
    %333 = vector.shape_cast %332 : vector<1x1x256xf32> to vector<1x256xf32>
    %334 = vector.broadcast %331 : f32 to vector<1x256xf32>
    %335 = arith.mulf %334, %333 : vector<1x256xf32>
    %336 = arith.addf %330, %335 : vector<1x256xf32>
    %c4_259 = arith.constant 4 : index
    %c1_260 = arith.constant 1 : index
    %337 = memref.load %arg4[%c4_259, %c1_260] : memref<8x4xf32, #tpu.memory_space<smem>>
    %c0_261 = arith.constant 0 : index
    %c1_262 = arith.constant 1 : index
    %c0_263 = arith.constant 0 : index
    %338 = vector.load %arg3[%c0_261, %c1_262, %c0_263] : memref<1x4x256xf32, #tpu.memory_space<vmem>>, vector<1x1x256xf32>
    %339 = vector.shape_cast %338 : vector<1x1x256xf32> to vector<1x256xf32>
    %340 = vector.broadcast %337 : f32 to vector<1x256xf32>
    %341 = arith.mulf %340, %339 : vector<1x256xf32>
    %342 = arith.addf %336, %341 : vector<1x256xf32>
    %c4_264 = arith.constant 4 : index
    %c2_265 = arith.constant 2 : index
    %343 = memref.load %arg4[%c4_264, %c2_265] : memref<8x4xf32, #tpu.memory_space<smem>>
    %c0_266 = arith.constant 0 : index
    %c2_267 = arith.constant 2 : index
    %c0_268 = arith.constant 0 : index
    %344 = vector.load %arg3[%c0_266, %c2_267, %c0_268] : memref<1x4x256xf32, #tpu.memory_space<vmem>>, vector<1x1x256xf32>
    %345 = vector.shape_cast %344 : vector<1x1x256xf32> to vector<1x256xf32>
    %346 = vector.broadcast %343 : f32 to vector<1x256xf32>
    %347 = arith.mulf %346, %345 : vector<1x256xf32>
    %348 = arith.addf %342, %347 : vector<1x256xf32>
    %c4_269 = arith.constant 4 : index
    %c3_270 = arith.constant 3 : index
    %349 = memref.load %arg4[%c4_269, %c3_270] : memref<8x4xf32, #tpu.memory_space<smem>>
    %c0_271 = arith.constant 0 : index
    %c3_272 = arith.constant 3 : index
    %c0_273 = arith.constant 0 : index
    %350 = vector.load %arg3[%c0_271, %c3_272, %c0_273] : memref<1x4x256xf32, #tpu.memory_space<vmem>>, vector<1x1x256xf32>
    %351 = vector.shape_cast %350 : vector<1x1x256xf32> to vector<1x256xf32>
    %352 = vector.broadcast %349 : f32 to vector<1x256xf32>
    %353 = arith.mulf %352, %351 : vector<1x256xf32>
    %354 = arith.addf %348, %353 : vector<1x256xf32>
    %c4_274 = arith.constant 4 : index
    %c0_275 = arith.constant 0 : index
    %355 = memref.load %arg5[%c4_274, %c0_275] : memref<8x8xf32, #tpu.memory_space<smem>>
    %c0_276 = arith.constant 0 : index
    %c0_277 = arith.constant 0 : index
    %c0_278 = arith.constant 0 : index
    %356 = vector.load %arg2[%c0_276, %c0_277, %c0_278] : memref<1x8x256xf32, #tpu.memory_space<vmem>>, vector<1x1x256xf32>
    %357 = vector.shape_cast %356 : vector<1x1x256xf32> to vector<1x256xf32>
    %358 = vector.broadcast %355 : f32 to vector<1x256xf32>
    %359 = arith.mulf %358, %357 : vector<1x256xf32>
    %360 = arith.addf %354, %359 : vector<1x256xf32>
    %c4_279 = arith.constant 4 : index
    %c1_280 = arith.constant 1 : index
    %361 = memref.load %arg5[%c4_279, %c1_280] : memref<8x8xf32, #tpu.memory_space<smem>>
    %c0_281 = arith.constant 0 : index
    %c1_282 = arith.constant 1 : index
    %c0_283 = arith.constant 0 : index
    %362 = vector.load %arg2[%c0_281, %c1_282, %c0_283] : memref<1x8x256xf32, #tpu.memory_space<vmem>>, vector<1x1x256xf32>
    %363 = vector.shape_cast %362 : vector<1x1x256xf32> to vector<1x256xf32>
    %364 = vector.broadcast %361 : f32 to vector<1x256xf32>
    %365 = arith.mulf %364, %363 : vector<1x256xf32>
    %366 = arith.addf %360, %365 : vector<1x256xf32>
    %c4_284 = arith.constant 4 : index
    %c2_285 = arith.constant 2 : index
    %367 = memref.load %arg5[%c4_284, %c2_285] : memref<8x8xf32, #tpu.memory_space<smem>>
    %c0_286 = arith.constant 0 : index
    %c2_287 = arith.constant 2 : index
    %c0_288 = arith.constant 0 : index
    %368 = vector.load %arg2[%c0_286, %c2_287, %c0_288] : memref<1x8x256xf32, #tpu.memory_space<vmem>>, vector<1x1x256xf32>
    %369 = vector.shape_cast %368 : vector<1x1x256xf32> to vector<1x256xf32>
    %370 = vector.broadcast %367 : f32 to vector<1x256xf32>
    %371 = arith.mulf %370, %369 : vector<1x256xf32>
    %372 = arith.addf %366, %371 : vector<1x256xf32>
    %c4_289 = arith.constant 4 : index
    %c3_290 = arith.constant 3 : index
    %373 = memref.load %arg5[%c4_289, %c3_290] : memref<8x8xf32, #tpu.memory_space<smem>>
    %c0_291 = arith.constant 0 : index
    %c3_292 = arith.constant 3 : index
    %c0_293 = arith.constant 0 : index
    %374 = vector.load %arg2[%c0_291, %c3_292, %c0_293] : memref<1x8x256xf32, #tpu.memory_space<vmem>>, vector<1x1x256xf32>
    %375 = vector.shape_cast %374 : vector<1x1x256xf32> to vector<1x256xf32>
    %376 = vector.broadcast %373 : f32 to vector<1x256xf32>
    %377 = arith.mulf %376, %375 : vector<1x256xf32>
    %378 = arith.addf %372, %377 : vector<1x256xf32>
    %c4_294 = arith.constant 4 : index
    %c4_295 = arith.constant 4 : index
    %379 = memref.load %arg5[%c4_294, %c4_295] : memref<8x8xf32, #tpu.memory_space<smem>>
    %c0_296 = arith.constant 0 : index
    %c4_297 = arith.constant 4 : index
    %c0_298 = arith.constant 0 : index
    %380 = vector.load %arg2[%c0_296, %c4_297, %c0_298] : memref<1x8x256xf32, #tpu.memory_space<vmem>>, vector<1x1x256xf32>
    %381 = vector.shape_cast %380 : vector<1x1x256xf32> to vector<1x256xf32>
    %382 = vector.broadcast %379 : f32 to vector<1x256xf32>
    %383 = arith.mulf %382, %381 : vector<1x256xf32>
    %384 = arith.addf %378, %383 : vector<1x256xf32>
    %c4_299 = arith.constant 4 : index
    %c5_300 = arith.constant 5 : index
    %385 = memref.load %arg5[%c4_299, %c5_300] : memref<8x8xf32, #tpu.memory_space<smem>>
    %c0_301 = arith.constant 0 : index
    %c5_302 = arith.constant 5 : index
    %c0_303 = arith.constant 0 : index
    %386 = vector.load %arg2[%c0_301, %c5_302, %c0_303] : memref<1x8x256xf32, #tpu.memory_space<vmem>>, vector<1x1x256xf32>
    %387 = vector.shape_cast %386 : vector<1x1x256xf32> to vector<1x256xf32>
    %388 = vector.broadcast %385 : f32 to vector<1x256xf32>
    %389 = arith.mulf %388, %387 : vector<1x256xf32>
    %390 = arith.addf %384, %389 : vector<1x256xf32>
    %c4_304 = arith.constant 4 : index
    %c6_305 = arith.constant 6 : index
    %391 = memref.load %arg5[%c4_304, %c6_305] : memref<8x8xf32, #tpu.memory_space<smem>>
    %c0_306 = arith.constant 0 : index
    %c6_307 = arith.constant 6 : index
    %c0_308 = arith.constant 0 : index
    %392 = vector.load %arg2[%c0_306, %c6_307, %c0_308] : memref<1x8x256xf32, #tpu.memory_space<vmem>>, vector<1x1x256xf32>
    %393 = vector.shape_cast %392 : vector<1x1x256xf32> to vector<1x256xf32>
    %394 = vector.broadcast %391 : f32 to vector<1x256xf32>
    %395 = arith.mulf %394, %393 : vector<1x256xf32>
    %396 = arith.addf %390, %395 : vector<1x256xf32>
    %c4_309 = arith.constant 4 : index
    %c7_310 = arith.constant 7 : index
    %397 = memref.load %arg5[%c4_309, %c7_310] : memref<8x8xf32, #tpu.memory_space<smem>>
    %c0_311 = arith.constant 0 : index
    %c7_312 = arith.constant 7 : index
    %c0_313 = arith.constant 0 : index
    %398 = vector.load %arg2[%c0_311, %c7_312, %c0_313] : memref<1x8x256xf32, #tpu.memory_space<vmem>>, vector<1x1x256xf32>
    %399 = vector.shape_cast %398 : vector<1x1x256xf32> to vector<1x256xf32>
    %400 = vector.broadcast %397 : f32 to vector<1x256xf32>
    %401 = arith.mulf %400, %399 : vector<1x256xf32>
    %402 = arith.addf %396, %401 : vector<1x256xf32>
    %c4_314 = arith.constant 4 : index
    %403 = memref.load %arg7[%c4_314] : memref<8xf32, #tpu.memory_space<smem>>
    %cst_315 = arith.constant 0.000000e+00 : f32
    %404 = vector.broadcast %cst_315 : f32 to vector<1x256xf32>
    %405 = arith.maximumf %402, %404 : vector<1x256xf32>
    %406 = vector.broadcast %403 : f32 to vector<1x256xf32>
    %407 = arith.mulf %406, %405 : vector<1x256xf32>
    %408 = arith.addf %328, %407 : vector<1x256xf32>
    %c5_316 = arith.constant 5 : index
    %409 = memref.load %arg6[%c5_316] : memref<8xf32, #tpu.memory_space<smem>>
    %410 = vector.broadcast %409 : f32 to vector<1x256xf32>
    %c5_317 = arith.constant 5 : index
    %c0_318 = arith.constant 0 : index
    %411 = memref.load %arg4[%c5_317, %c0_318] : memref<8x4xf32, #tpu.memory_space<smem>>
    %c0_319 = arith.constant 0 : index
    %c0_320 = arith.constant 0 : index
    %c0_321 = arith.constant 0 : index
    %412 = vector.load %arg3[%c0_319, %c0_320, %c0_321] : memref<1x4x256xf32, #tpu.memory_space<vmem>>, vector<1x1x256xf32>
    %413 = vector.shape_cast %412 : vector<1x1x256xf32> to vector<1x256xf32>
    %414 = vector.broadcast %411 : f32 to vector<1x256xf32>
    %415 = arith.mulf %414, %413 : vector<1x256xf32>
    %416 = arith.addf %410, %415 : vector<1x256xf32>
    %c5_322 = arith.constant 5 : index
    %c1_323 = arith.constant 1 : index
    %417 = memref.load %arg4[%c5_322, %c1_323] : memref<8x4xf32, #tpu.memory_space<smem>>
    %c0_324 = arith.constant 0 : index
    %c1_325 = arith.constant 1 : index
    %c0_326 = arith.constant 0 : index
    %418 = vector.load %arg3[%c0_324, %c1_325, %c0_326] : memref<1x4x256xf32, #tpu.memory_space<vmem>>, vector<1x1x256xf32>
    %419 = vector.shape_cast %418 : vector<1x1x256xf32> to vector<1x256xf32>
    %420 = vector.broadcast %417 : f32 to vector<1x256xf32>
    %421 = arith.mulf %420, %419 : vector<1x256xf32>
    %422 = arith.addf %416, %421 : vector<1x256xf32>
    %c5_327 = arith.constant 5 : index
    %c2_328 = arith.constant 2 : index
    %423 = memref.load %arg4[%c5_327, %c2_328] : memref<8x4xf32, #tpu.memory_space<smem>>
    %c0_329 = arith.constant 0 : index
    %c2_330 = arith.constant 2 : index
    %c0_331 = arith.constant 0 : index
    %424 = vector.load %arg3[%c0_329, %c2_330, %c0_331] : memref<1x4x256xf32, #tpu.memory_space<vmem>>, vector<1x1x256xf32>
    %425 = vector.shape_cast %424 : vector<1x1x256xf32> to vector<1x256xf32>
    %426 = vector.broadcast %423 : f32 to vector<1x256xf32>
    %427 = arith.mulf %426, %425 : vector<1x256xf32>
    %428 = arith.addf %422, %427 : vector<1x256xf32>
    %c5_332 = arith.constant 5 : index
    %c3_333 = arith.constant 3 : index
    %429 = memref.load %arg4[%c5_332, %c3_333] : memref<8x4xf32, #tpu.memory_space<smem>>
    %c0_334 = arith.constant 0 : index
    %c3_335 = arith.constant 3 : index
    %c0_336 = arith.constant 0 : index
    %430 = vector.load %arg3[%c0_334, %c3_335, %c0_336] : memref<1x4x256xf32, #tpu.memory_space<vmem>>, vector<1x1x256xf32>
    %431 = vector.shape_cast %430 : vector<1x1x256xf32> to vector<1x256xf32>
    %432 = vector.broadcast %429 : f32 to vector<1x256xf32>
    %433 = arith.mulf %432, %431 : vector<1x256xf32>
    %434 = arith.addf %428, %433 : vector<1x256xf32>
    %c5_337 = arith.constant 5 : index
    %c0_338 = arith.constant 0 : index
    %435 = memref.load %arg5[%c5_337, %c0_338] : memref<8x8xf32, #tpu.memory_space<smem>>
    %c0_339 = arith.constant 0 : index
    %c0_340 = arith.constant 0 : index
    %c0_341 = arith.constant 0 : index
    %436 = vector.load %arg2[%c0_339, %c0_340, %c0_341] : memref<1x8x256xf32, #tpu.memory_space<vmem>>, vector<1x1x256xf32>
    %437 = vector.shape_cast %436 : vector<1x1x256xf32> to vector<1x256xf32>
    %438 = vector.broadcast %435 : f32 to vector<1x256xf32>
    %439 = arith.mulf %438, %437 : vector<1x256xf32>
    %440 = arith.addf %434, %439 : vector<1x256xf32>
    %c5_342 = arith.constant 5 : index
    %c1_343 = arith.constant 1 : index
    %441 = memref.load %arg5[%c5_342, %c1_343] : memref<8x8xf32, #tpu.memory_space<smem>>
    %c0_344 = arith.constant 0 : index
    %c1_345 = arith.constant 1 : index
    %c0_346 = arith.constant 0 : index
    %442 = vector.load %arg2[%c0_344, %c1_345, %c0_346] : memref<1x8x256xf32, #tpu.memory_space<vmem>>, vector<1x1x256xf32>
    %443 = vector.shape_cast %442 : vector<1x1x256xf32> to vector<1x256xf32>
    %444 = vector.broadcast %441 : f32 to vector<1x256xf32>
    %445 = arith.mulf %444, %443 : vector<1x256xf32>
    %446 = arith.addf %440, %445 : vector<1x256xf32>
    %c5_347 = arith.constant 5 : index
    %c2_348 = arith.constant 2 : index
    %447 = memref.load %arg5[%c5_347, %c2_348] : memref<8x8xf32, #tpu.memory_space<smem>>
    %c0_349 = arith.constant 0 : index
    %c2_350 = arith.constant 2 : index
    %c0_351 = arith.constant 0 : index
    %448 = vector.load %arg2[%c0_349, %c2_350, %c0_351] : memref<1x8x256xf32, #tpu.memory_space<vmem>>, vector<1x1x256xf32>
    %449 = vector.shape_cast %448 : vector<1x1x256xf32> to vector<1x256xf32>
    %450 = vector.broadcast %447 : f32 to vector<1x256xf32>
    %451 = arith.mulf %450, %449 : vector<1x256xf32>
    %452 = arith.addf %446, %451 : vector<1x256xf32>
    %c5_352 = arith.constant 5 : index
    %c3_353 = arith.constant 3 : index
    %453 = memref.load %arg5[%c5_352, %c3_353] : memref<8x8xf32, #tpu.memory_space<smem>>
    %c0_354 = arith.constant 0 : index
    %c3_355 = arith.constant 3 : index
    %c0_356 = arith.constant 0 : index
    %454 = vector.load %arg2[%c0_354, %c3_355, %c0_356] : memref<1x8x256xf32, #tpu.memory_space<vmem>>, vector<1x1x256xf32>
    %455 = vector.shape_cast %454 : vector<1x1x256xf32> to vector<1x256xf32>
    %456 = vector.broadcast %453 : f32 to vector<1x256xf32>
    %457 = arith.mulf %456, %455 : vector<1x256xf32>
    %458 = arith.addf %452, %457 : vector<1x256xf32>
    %c5_357 = arith.constant 5 : index
    %c4_358 = arith.constant 4 : index
    %459 = memref.load %arg5[%c5_357, %c4_358] : memref<8x8xf32, #tpu.memory_space<smem>>
    %c0_359 = arith.constant 0 : index
    %c4_360 = arith.constant 4 : index
    %c0_361 = arith.constant 0 : index
    %460 = vector.load %arg2[%c0_359, %c4_360, %c0_361] : memref<1x8x256xf32, #tpu.memory_space<vmem>>, vector<1x1x256xf32>
    %461 = vector.shape_cast %460 : vector<1x1x256xf32> to vector<1x256xf32>
    %462 = vector.broadcast %459 : f32 to vector<1x256xf32>
    %463 = arith.mulf %462, %461 : vector<1x256xf32>
    %464 = arith.addf %458, %463 : vector<1x256xf32>
    %c5_362 = arith.constant 5 : index
    %c5_363 = arith.constant 5 : index
    %465 = memref.load %arg5[%c5_362, %c5_363] : memref<8x8xf32, #tpu.memory_space<smem>>
    %c0_364 = arith.constant 0 : index
    %c5_365 = arith.constant 5 : index
    %c0_366 = arith.constant 0 : index
    %466 = vector.load %arg2[%c0_364, %c5_365, %c0_366] : memref<1x8x256xf32, #tpu.memory_space<vmem>>, vector<1x1x256xf32>
    %467 = vector.shape_cast %466 : vector<1x1x256xf32> to vector<1x256xf32>
    %468 = vector.broadcast %465 : f32 to vector<1x256xf32>
    %469 = arith.mulf %468, %467 : vector<1x256xf32>
    %470 = arith.addf %464, %469 : vector<1x256xf32>
    %c5_367 = arith.constant 5 : index
    %c6_368 = arith.constant 6 : index
    %471 = memref.load %arg5[%c5_367, %c6_368] : memref<8x8xf32, #tpu.memory_space<smem>>
    %c0_369 = arith.constant 0 : index
    %c6_370 = arith.constant 6 : index
    %c0_371 = arith.constant 0 : index
    %472 = vector.load %arg2[%c0_369, %c6_370, %c0_371] : memref<1x8x256xf32, #tpu.memory_space<vmem>>, vector<1x1x256xf32>
    %473 = vector.shape_cast %472 : vector<1x1x256xf32> to vector<1x256xf32>
    %474 = vector.broadcast %471 : f32 to vector<1x256xf32>
    %475 = arith.mulf %474, %473 : vector<1x256xf32>
    %476 = arith.addf %470, %475 : vector<1x256xf32>
    %c5_372 = arith.constant 5 : index
    %c7_373 = arith.constant 7 : index
    %477 = memref.load %arg5[%c5_372, %c7_373] : memref<8x8xf32, #tpu.memory_space<smem>>
    %c0_374 = arith.constant 0 : index
    %c7_375 = arith.constant 7 : index
    %c0_376 = arith.constant 0 : index
    %478 = vector.load %arg2[%c0_374, %c7_375, %c0_376] : memref<1x8x256xf32, #tpu.memory_space<vmem>>, vector<1x1x256xf32>
    %479 = vector.shape_cast %478 : vector<1x1x256xf32> to vector<1x256xf32>
    %480 = vector.broadcast %477 : f32 to vector<1x256xf32>
    %481 = arith.mulf %480, %479 : vector<1x256xf32>
    %482 = arith.addf %476, %481 : vector<1x256xf32>
    %c5_377 = arith.constant 5 : index
    %483 = memref.load %arg7[%c5_377] : memref<8xf32, #tpu.memory_space<smem>>
    %cst_378 = arith.constant 0.000000e+00 : f32
    %484 = vector.broadcast %cst_378 : f32 to vector<1x256xf32>
    %485 = arith.maximumf %482, %484 : vector<1x256xf32>
    %486 = vector.broadcast %483 : f32 to vector<1x256xf32>
    %487 = arith.mulf %486, %485 : vector<1x256xf32>
    %488 = arith.addf %408, %487 : vector<1x256xf32>
    %c6_379 = arith.constant 6 : index
    %489 = memref.load %arg6[%c6_379] : memref<8xf32, #tpu.memory_space<smem>>
    %490 = vector.broadcast %489 : f32 to vector<1x256xf32>
    %c6_380 = arith.constant 6 : index
    %c0_381 = arith.constant 0 : index
    %491 = memref.load %arg4[%c6_380, %c0_381] : memref<8x4xf32, #tpu.memory_space<smem>>
    %c0_382 = arith.constant 0 : index
    %c0_383 = arith.constant 0 : index
    %c0_384 = arith.constant 0 : index
    %492 = vector.load %arg3[%c0_382, %c0_383, %c0_384] : memref<1x4x256xf32, #tpu.memory_space<vmem>>, vector<1x1x256xf32>
    %493 = vector.shape_cast %492 : vector<1x1x256xf32> to vector<1x256xf32>
    %494 = vector.broadcast %491 : f32 to vector<1x256xf32>
    %495 = arith.mulf %494, %493 : vector<1x256xf32>
    %496 = arith.addf %490, %495 : vector<1x256xf32>
    %c6_385 = arith.constant 6 : index
    %c1_386 = arith.constant 1 : index
    %497 = memref.load %arg4[%c6_385, %c1_386] : memref<8x4xf32, #tpu.memory_space<smem>>
    %c0_387 = arith.constant 0 : index
    %c1_388 = arith.constant 1 : index
    %c0_389 = arith.constant 0 : index
    %498 = vector.load %arg3[%c0_387, %c1_388, %c0_389] : memref<1x4x256xf32, #tpu.memory_space<vmem>>, vector<1x1x256xf32>
    %499 = vector.shape_cast %498 : vector<1x1x256xf32> to vector<1x256xf32>
    %500 = vector.broadcast %497 : f32 to vector<1x256xf32>
    %501 = arith.mulf %500, %499 : vector<1x256xf32>
    %502 = arith.addf %496, %501 : vector<1x256xf32>
    %c6_390 = arith.constant 6 : index
    %c2_391 = arith.constant 2 : index
    %503 = memref.load %arg4[%c6_390, %c2_391] : memref<8x4xf32, #tpu.memory_space<smem>>
    %c0_392 = arith.constant 0 : index
    %c2_393 = arith.constant 2 : index
    %c0_394 = arith.constant 0 : index
    %504 = vector.load %arg3[%c0_392, %c2_393, %c0_394] : memref<1x4x256xf32, #tpu.memory_space<vmem>>, vector<1x1x256xf32>
    %505 = vector.shape_cast %504 : vector<1x1x256xf32> to vector<1x256xf32>
    %506 = vector.broadcast %503 : f32 to vector<1x256xf32>
    %507 = arith.mulf %506, %505 : vector<1x256xf32>
    %508 = arith.addf %502, %507 : vector<1x256xf32>
    %c6_395 = arith.constant 6 : index
    %c3_396 = arith.constant 3 : index
    %509 = memref.load %arg4[%c6_395, %c3_396] : memref<8x4xf32, #tpu.memory_space<smem>>
    %c0_397 = arith.constant 0 : index
    %c3_398 = arith.constant 3 : index
    %c0_399 = arith.constant 0 : index
    %510 = vector.load %arg3[%c0_397, %c3_398, %c0_399] : memref<1x4x256xf32, #tpu.memory_space<vmem>>, vector<1x1x256xf32>
    %511 = vector.shape_cast %510 : vector<1x1x256xf32> to vector<1x256xf32>
    %512 = vector.broadcast %509 : f32 to vector<1x256xf32>
    %513 = arith.mulf %512, %511 : vector<1x256xf32>
    %514 = arith.addf %508, %513 : vector<1x256xf32>
    %c6_400 = arith.constant 6 : index
    %c0_401 = arith.constant 0 : index
    %515 = memref.load %arg5[%c6_400, %c0_401] : memref<8x8xf32, #tpu.memory_space<smem>>
    %c0_402 = arith.constant 0 : index
    %c0_403 = arith.constant 0 : index
    %c0_404 = arith.constant 0 : index
    %516 = vector.load %arg2[%c0_402, %c0_403, %c0_404] : memref<1x8x256xf32, #tpu.memory_space<vmem>>, vector<1x1x256xf32>
    %517 = vector.shape_cast %516 : vector<1x1x256xf32> to vector<1x256xf32>
    %518 = vector.broadcast %515 : f32 to vector<1x256xf32>
    %519 = arith.mulf %518, %517 : vector<1x256xf32>
    %520 = arith.addf %514, %519 : vector<1x256xf32>
    %c6_405 = arith.constant 6 : index
    %c1_406 = arith.constant 1 : index
    %521 = memref.load %arg5[%c6_405, %c1_406] : memref<8x8xf32, #tpu.memory_space<smem>>
    %c0_407 = arith.constant 0 : index
    %c1_408 = arith.constant 1 : index
    %c0_409 = arith.constant 0 : index
    %522 = vector.load %arg2[%c0_407, %c1_408, %c0_409] : memref<1x8x256xf32, #tpu.memory_space<vmem>>, vector<1x1x256xf32>
    %523 = vector.shape_cast %522 : vector<1x1x256xf32> to vector<1x256xf32>
    %524 = vector.broadcast %521 : f32 to vector<1x256xf32>
    %525 = arith.mulf %524, %523 : vector<1x256xf32>
    %526 = arith.addf %520, %525 : vector<1x256xf32>
    %c6_410 = arith.constant 6 : index
    %c2_411 = arith.constant 2 : index
    %527 = memref.load %arg5[%c6_410, %c2_411] : memref<8x8xf32, #tpu.memory_space<smem>>
    %c0_412 = arith.constant 0 : index
    %c2_413 = arith.constant 2 : index
    %c0_414 = arith.constant 0 : index
    %528 = vector.load %arg2[%c0_412, %c2_413, %c0_414] : memref<1x8x256xf32, #tpu.memory_space<vmem>>, vector<1x1x256xf32>
    %529 = vector.shape_cast %528 : vector<1x1x256xf32> to vector<1x256xf32>
    %530 = vector.broadcast %527 : f32 to vector<1x256xf32>
    %531 = arith.mulf %530, %529 : vector<1x256xf32>
    %532 = arith.addf %526, %531 : vector<1x256xf32>
    %c6_415 = arith.constant 6 : index
    %c3_416 = arith.constant 3 : index
    %533 = memref.load %arg5[%c6_415, %c3_416] : memref<8x8xf32, #tpu.memory_space<smem>>
    %c0_417 = arith.constant 0 : index
    %c3_418 = arith.constant 3 : index
    %c0_419 = arith.constant 0 : index
    %534 = vector.load %arg2[%c0_417, %c3_418, %c0_419] : memref<1x8x256xf32, #tpu.memory_space<vmem>>, vector<1x1x256xf32>
    %535 = vector.shape_cast %534 : vector<1x1x256xf32> to vector<1x256xf32>
    %536 = vector.broadcast %533 : f32 to vector<1x256xf32>
    %537 = arith.mulf %536, %535 : vector<1x256xf32>
    %538 = arith.addf %532, %537 : vector<1x256xf32>
    %c6_420 = arith.constant 6 : index
    %c4_421 = arith.constant 4 : index
    %539 = memref.load %arg5[%c6_420, %c4_421] : memref<8x8xf32, #tpu.memory_space<smem>>
    %c0_422 = arith.constant 0 : index
    %c4_423 = arith.constant 4 : index
    %c0_424 = arith.constant 0 : index
    %540 = vector.load %arg2[%c0_422, %c4_423, %c0_424] : memref<1x8x256xf32, #tpu.memory_space<vmem>>, vector<1x1x256xf32>
    %541 = vector.shape_cast %540 : vector<1x1x256xf32> to vector<1x256xf32>
    %542 = vector.broadcast %539 : f32 to vector<1x256xf32>
    %543 = arith.mulf %542, %541 : vector<1x256xf32>
    %544 = arith.addf %538, %543 : vector<1x256xf32>
    %c6_425 = arith.constant 6 : index
    %c5_426 = arith.constant 5 : index
    %545 = memref.load %arg5[%c6_425, %c5_426] : memref<8x8xf32, #tpu.memory_space<smem>>
    %c0_427 = arith.constant 0 : index
    %c5_428 = arith.constant 5 : index
    %c0_429 = arith.constant 0 : index
    %546 = vector.load %arg2[%c0_427, %c5_428, %c0_429] : memref<1x8x256xf32, #tpu.memory_space<vmem>>, vector<1x1x256xf32>
    %547 = vector.shape_cast %546 : vector<1x1x256xf32> to vector<1x256xf32>
    %548 = vector.broadcast %545 : f32 to vector<1x256xf32>
    %549 = arith.mulf %548, %547 : vector<1x256xf32>
    %550 = arith.addf %544, %549 : vector<1x256xf32>
    %c6_430 = arith.constant 6 : index
    %c6_431 = arith.constant 6 : index
    %551 = memref.load %arg5[%c6_430, %c6_431] : memref<8x8xf32, #tpu.memory_space<smem>>
    %c0_432 = arith.constant 0 : index
    %c6_433 = arith.constant 6 : index
    %c0_434 = arith.constant 0 : index
    %552 = vector.load %arg2[%c0_432, %c6_433, %c0_434] : memref<1x8x256xf32, #tpu.memory_space<vmem>>, vector<1x1x256xf32>
    %553 = vector.shape_cast %552 : vector<1x1x256xf32> to vector<1x256xf32>
    %554 = vector.broadcast %551 : f32 to vector<1x256xf32>
    %555 = arith.mulf %554, %553 : vector<1x256xf32>
    %556 = arith.addf %550, %555 : vector<1x256xf32>
    %c6_435 = arith.constant 6 : index
    %c7_436 = arith.constant 7 : index
    %557 = memref.load %arg5[%c6_435, %c7_436] : memref<8x8xf32, #tpu.memory_space<smem>>
    %c0_437 = arith.constant 0 : index
    %c7_438 = arith.constant 7 : index
    %c0_439 = arith.constant 0 : index
    %558 = vector.load %arg2[%c0_437, %c7_438, %c0_439] : memref<1x8x256xf32, #tpu.memory_space<vmem>>, vector<1x1x256xf32>
    %559 = vector.shape_cast %558 : vector<1x1x256xf32> to vector<1x256xf32>
    %560 = vector.broadcast %557 : f32 to vector<1x256xf32>
    %561 = arith.mulf %560, %559 : vector<1x256xf32>
    %562 = arith.addf %556, %561 : vector<1x256xf32>
    %c6_440 = arith.constant 6 : index
    %563 = memref.load %arg7[%c6_440] : memref<8xf32, #tpu.memory_space<smem>>
    %cst_441 = arith.constant 0.000000e+00 : f32
    %564 = vector.broadcast %cst_441 : f32 to vector<1x256xf32>
    %565 = arith.maximumf %562, %564 : vector<1x256xf32>
    %566 = vector.broadcast %563 : f32 to vector<1x256xf32>
    %567 = arith.mulf %566, %565 : vector<1x256xf32>
    %568 = arith.addf %488, %567 : vector<1x256xf32>
    %c7_442 = arith.constant 7 : index
    %569 = memref.load %arg6[%c7_442] : memref<8xf32, #tpu.memory_space<smem>>
    %570 = vector.broadcast %569 : f32 to vector<1x256xf32>
    %c7_443 = arith.constant 7 : index
    %c0_444 = arith.constant 0 : index
    %571 = memref.load %arg4[%c7_443, %c0_444] : memref<8x4xf32, #tpu.memory_space<smem>>
    %c0_445 = arith.constant 0 : index
    %c0_446 = arith.constant 0 : index
    %c0_447 = arith.constant 0 : index
    %572 = vector.load %arg3[%c0_445, %c0_446, %c0_447] : memref<1x4x256xf32, #tpu.memory_space<vmem>>, vector<1x1x256xf32>
    %573 = vector.shape_cast %572 : vector<1x1x256xf32> to vector<1x256xf32>
    %574 = vector.broadcast %571 : f32 to vector<1x256xf32>
    %575 = arith.mulf %574, %573 : vector<1x256xf32>
    %576 = arith.addf %570, %575 : vector<1x256xf32>
    %c7_448 = arith.constant 7 : index
    %c1_449 = arith.constant 1 : index
    %577 = memref.load %arg4[%c7_448, %c1_449] : memref<8x4xf32, #tpu.memory_space<smem>>
    %c0_450 = arith.constant 0 : index
    %c1_451 = arith.constant 1 : index
    %c0_452 = arith.constant 0 : index
    %578 = vector.load %arg3[%c0_450, %c1_451, %c0_452] : memref<1x4x256xf32, #tpu.memory_space<vmem>>, vector<1x1x256xf32>
    %579 = vector.shape_cast %578 : vector<1x1x256xf32> to vector<1x256xf32>
    %580 = vector.broadcast %577 : f32 to vector<1x256xf32>
    %581 = arith.mulf %580, %579 : vector<1x256xf32>
    %582 = arith.addf %576, %581 : vector<1x256xf32>
    %c7_453 = arith.constant 7 : index
    %c2_454 = arith.constant 2 : index
    %583 = memref.load %arg4[%c7_453, %c2_454] : memref<8x4xf32, #tpu.memory_space<smem>>
    %c0_455 = arith.constant 0 : index
    %c2_456 = arith.constant 2 : index
    %c0_457 = arith.constant 0 : index
    %584 = vector.load %arg3[%c0_455, %c2_456, %c0_457] : memref<1x4x256xf32, #tpu.memory_space<vmem>>, vector<1x1x256xf32>
    %585 = vector.shape_cast %584 : vector<1x1x256xf32> to vector<1x256xf32>
    %586 = vector.broadcast %583 : f32 to vector<1x256xf32>
    %587 = arith.mulf %586, %585 : vector<1x256xf32>
    %588 = arith.addf %582, %587 : vector<1x256xf32>
    %c7_458 = arith.constant 7 : index
    %c3_459 = arith.constant 3 : index
    %589 = memref.load %arg4[%c7_458, %c3_459] : memref<8x4xf32, #tpu.memory_space<smem>>
    %c0_460 = arith.constant 0 : index
    %c3_461 = arith.constant 3 : index
    %c0_462 = arith.constant 0 : index
    %590 = vector.load %arg3[%c0_460, %c3_461, %c0_462] : memref<1x4x256xf32, #tpu.memory_space<vmem>>, vector<1x1x256xf32>
    %591 = vector.shape_cast %590 : vector<1x1x256xf32> to vector<1x256xf32>
    %592 = vector.broadcast %589 : f32 to vector<1x256xf32>
    %593 = arith.mulf %592, %591 : vector<1x256xf32>
    %594 = arith.addf %588, %593 : vector<1x256xf32>
    %c7_463 = arith.constant 7 : index
    %c0_464 = arith.constant 0 : index
    %595 = memref.load %arg5[%c7_463, %c0_464] : memref<8x8xf32, #tpu.memory_space<smem>>
    %c0_465 = arith.constant 0 : index
    %c0_466 = arith.constant 0 : index
    %c0_467 = arith.constant 0 : index
    %596 = vector.load %arg2[%c0_465, %c0_466, %c0_467] : memref<1x8x256xf32, #tpu.memory_space<vmem>>, vector<1x1x256xf32>
    %597 = vector.shape_cast %596 : vector<1x1x256xf32> to vector<1x256xf32>
    %598 = vector.broadcast %595 : f32 to vector<1x256xf32>
    %599 = arith.mulf %598, %597 : vector<1x256xf32>
    %600 = arith.addf %594, %599 : vector<1x256xf32>
    %c7_468 = arith.constant 7 : index
    %c1_469 = arith.constant 1 : index
    %601 = memref.load %arg5[%c7_468, %c1_469] : memref<8x8xf32, #tpu.memory_space<smem>>
    %c0_470 = arith.constant 0 : index
    %c1_471 = arith.constant 1 : index
    %c0_472 = arith.constant 0 : index
    %602 = vector.load %arg2[%c0_470, %c1_471, %c0_472] : memref<1x8x256xf32, #tpu.memory_space<vmem>>, vector<1x1x256xf32>
    %603 = vector.shape_cast %602 : vector<1x1x256xf32> to vector<1x256xf32>
    %604 = vector.broadcast %601 : f32 to vector<1x256xf32>
    %605 = arith.mulf %604, %603 : vector<1x256xf32>
    %606 = arith.addf %600, %605 : vector<1x256xf32>
    %c7_473 = arith.constant 7 : index
    %c2_474 = arith.constant 2 : index
    %607 = memref.load %arg5[%c7_473, %c2_474] : memref<8x8xf32, #tpu.memory_space<smem>>
    %c0_475 = arith.constant 0 : index
    %c2_476 = arith.constant 2 : index
    %c0_477 = arith.constant 0 : index
    %608 = vector.load %arg2[%c0_475, %c2_476, %c0_477] : memref<1x8x256xf32, #tpu.memory_space<vmem>>, vector<1x1x256xf32>
    %609 = vector.shape_cast %608 : vector<1x1x256xf32> to vector<1x256xf32>
    %610 = vector.broadcast %607 : f32 to vector<1x256xf32>
    %611 = arith.mulf %610, %609 : vector<1x256xf32>
    %612 = arith.addf %606, %611 : vector<1x256xf32>
    %c7_478 = arith.constant 7 : index
    %c3_479 = arith.constant 3 : index
    %613 = memref.load %arg5[%c7_478, %c3_479] : memref<8x8xf32, #tpu.memory_space<smem>>
    %c0_480 = arith.constant 0 : index
    %c3_481 = arith.constant 3 : index
    %c0_482 = arith.constant 0 : index
    %614 = vector.load %arg2[%c0_480, %c3_481, %c0_482] : memref<1x8x256xf32, #tpu.memory_space<vmem>>, vector<1x1x256xf32>
    %615 = vector.shape_cast %614 : vector<1x1x256xf32> to vector<1x256xf32>
    %616 = vector.broadcast %613 : f32 to vector<1x256xf32>
    %617 = arith.mulf %616, %615 : vector<1x256xf32>
    %618 = arith.addf %612, %617 : vector<1x256xf32>
    %c7_483 = arith.constant 7 : index
    %c4_484 = arith.constant 4 : index
    %619 = memref.load %arg5[%c7_483, %c4_484] : memref<8x8xf32, #tpu.memory_space<smem>>
    %c0_485 = arith.constant 0 : index
    %c4_486 = arith.constant 4 : index
    %c0_487 = arith.constant 0 : index
    %620 = vector.load %arg2[%c0_485, %c4_486, %c0_487] : memref<1x8x256xf32, #tpu.memory_space<vmem>>, vector<1x1x256xf32>
    %621 = vector.shape_cast %620 : vector<1x1x256xf32> to vector<1x256xf32>
    %622 = vector.broadcast %619 : f32 to vector<1x256xf32>
    %623 = arith.mulf %622, %621 : vector<1x256xf32>
    %624 = arith.addf %618, %623 : vector<1x256xf32>
    %c7_488 = arith.constant 7 : index
    %c5_489 = arith.constant 5 : index
    %625 = memref.load %arg5[%c7_488, %c5_489] : memref<8x8xf32, #tpu.memory_space<smem>>
    %c0_490 = arith.constant 0 : index
    %c5_491 = arith.constant 5 : index
    %c0_492 = arith.constant 0 : index
    %626 = vector.load %arg2[%c0_490, %c5_491, %c0_492] : memref<1x8x256xf32, #tpu.memory_space<vmem>>, vector<1x1x256xf32>
    %627 = vector.shape_cast %626 : vector<1x1x256xf32> to vector<1x256xf32>
    %628 = vector.broadcast %625 : f32 to vector<1x256xf32>
    %629 = arith.mulf %628, %627 : vector<1x256xf32>
    %630 = arith.addf %624, %629 : vector<1x256xf32>
    %c7_493 = arith.constant 7 : index
    %c6_494 = arith.constant 6 : index
    %631 = memref.load %arg5[%c7_493, %c6_494] : memref<8x8xf32, #tpu.memory_space<smem>>
    %c0_495 = arith.constant 0 : index
    %c6_496 = arith.constant 6 : index
    %c0_497 = arith.constant 0 : index
    %632 = vector.load %arg2[%c0_495, %c6_496, %c0_497] : memref<1x8x256xf32, #tpu.memory_space<vmem>>, vector<1x1x256xf32>
    %633 = vector.shape_cast %632 : vector<1x1x256xf32> to vector<1x256xf32>
    %634 = vector.broadcast %631 : f32 to vector<1x256xf32>
    %635 = arith.mulf %634, %633 : vector<1x256xf32>
    %636 = arith.addf %630, %635 : vector<1x256xf32>
    %c7_498 = arith.constant 7 : index
    %c7_499 = arith.constant 7 : index
    %637 = memref.load %arg5[%c7_498, %c7_499] : memref<8x8xf32, #tpu.memory_space<smem>>
    %c0_500 = arith.constant 0 : index
    %c7_501 = arith.constant 7 : index
    %c0_502 = arith.constant 0 : index
    %638 = vector.load %arg2[%c0_500, %c7_501, %c0_502] : memref<1x8x256xf32, #tpu.memory_space<vmem>>, vector<1x1x256xf32>
    %639 = vector.shape_cast %638 : vector<1x1x256xf32> to vector<1x256xf32>
    %640 = vector.broadcast %637 : f32 to vector<1x256xf32>
    %641 = arith.mulf %640, %639 : vector<1x256xf32>
    %642 = arith.addf %636, %641 : vector<1x256xf32>
    %c7_503 = arith.constant 7 : index
    %643 = memref.load %arg7[%c7_503] : memref<8xf32, #tpu.memory_space<smem>>
    %cst_504 = arith.constant 0.000000e+00 : f32
    %644 = vector.broadcast %cst_504 : f32 to vector<1x256xf32>
    %645 = arith.maximumf %642, %644 : vector<1x256xf32>
    %646 = vector.broadcast %643 : f32 to vector<1x256xf32>
    %647 = arith.mulf %646, %645 : vector<1x256xf32>
    %648 = arith.addf %568, %647 : vector<1x256xf32>
    %649 = arith.negf %648 : vector<1x256xf32>
    %650 = math.exp %649 : vector<1x256xf32>
    %cst_505 = arith.constant 1.000000e+00 : f32
    %651 = vector.broadcast %cst_505 : f32 to vector<1x256xf32>
    %652 = arith.addf %651, %650 : vector<1x256xf32>
    %653 = arith.divf %651, %652 : vector<1x256xf32>
    %654 = vector.broadcast %653 : vector<1x256xf32> to vector<4x256xf32>
    %655 = arith.mulf %6, %654 : vector<4x256xf32>
    %c0_506 = arith.constant 0 : index
    %c8 = arith.constant 8 : index
    %c0_507 = arith.constant 0 : index
    %656 = vector.load %arg9[%c0_506, %c8, %c0_507] : memref<1x12x256xf32, #tpu.memory_space<vmem>>, vector<1x4x256xf32>
    %657 = vector.shape_cast %656 : vector<1x4x256xf32> to vector<4x256xf32>
    %658 = vector.shape_cast %655 : vector<4x256xf32> to vector<1x4x256xf32>
    tpu.vector_store %arg9[%c0_506, %c8, %c0_507], %658 {strides = array<i32>} : memref<1x12x256xf32, #tpu.memory_space<vmem>>, vector<1x4x256xf32>,
    return
  }
  func.func @transform_0(%arg0: i32, %arg1: i32) -> (i32, i32, i32) {
    %c0_i32 = arith.constant 0 : i32
    %c0_i32_0 = arith.constant 0 : i32
    return %arg0, %c0_i32, %arg1 : i32, i32, i32
  }
  func.func @transform_1(%arg0: i32, %arg1: i32) -> (i32, i32, i32) {
    %c0_i32 = arith.constant 0 : i32
    %c0_i32_0 = arith.constant 0 : i32
    return %arg0, %c0_i32, %arg1 : i32, i32, i32
  }
  func.func @transform_2(%arg0: i32, %arg1: i32) -> (i32, i32) {
    %c0_i32 = arith.constant 0 : i32
    %c0_i32_0 = arith.constant 0 : i32
    %c0_i32_1 = arith.constant 0 : i32
    return %c0_i32, %c0_i32_0 : i32, i32
  }
  func.func @transform_3(%arg0: i32, %arg1: i32) -> (i32, i32) {
    %c0_i32 = arith.constant 0 : i32
    %c0_i32_0 = arith.constant 0 : i32
    %c0_i32_1 = arith.constant 0 : i32
    return %c0_i32, %c0_i32_0 : i32, i32
  }
  func.func @transform_4(%arg0: i32, %arg1: i32) -> i32 {
    %c0_i32 = arith.constant 0 : i32
    %c0_i32_0 = arith.constant 0 : i32
    return %c0_i32 : i32
  }
  func.func @transform_5(%arg0: i32, %arg1: i32) -> i32 {
    %c0_i32 = arith.constant 0 : i32
    %c0_i32_0 = arith.constant 0 : i32
    return %c0_i32 : i32
  }
  func.func @transform_6(%arg0: i32, %arg1: i32) -> i32 {
    %c0_i32 = arith.constant 0 : i32
    %c0_i32_0 = arith.constant 0 : i32
    return %c0_i32 : i32
  }
  func.func @transform_7(%arg0: i32, %arg1: i32) -> (i32, i32, i32) {
    %c0_i32 = arith.constant 0 : i32
    %c0_i32_0 = arith.constant 0 : i32
    return %arg0, %c0_i32, %arg1 : i32, i32, i32
  }
}

</mosaic_0001>

<bundles_post_ra>
// kernel: attention_concat.1
= control target key start
LH: loop header
LB: loop body
LE: loop exit
PB: predicated region body
PF: predicated region fallthrough
CT: control target
= control target key end

     0   :  { %s1968_s0 = inlined_call_operand.vmem [shape: f32[2,8,256], index: 0, kind: input, shape index: {}]   ;;  %s1969_s1 = inlined_call_operand.vmem [shape: f32[2,4,256], index: 1, kind: input, shape index: {}]   ;;  %s1970_s2 = inlined_call_operand.vmem [shape: f32[8,4], index: 2, kind: input, shape index: {}]   ;;  %s1971_s3 = inlined_call_operand.vmem [shape: f32[8,8], index: 3, kind: input, shape index: {}]   ;;  %s1972_s4 = inlined_call_operand.vmem [shape: f32[8], index: 4, kind: input, shape index: {}]   ;;  %s1973_s5 = inlined_call_operand.vmem [shape: f32[8], index: 5, kind: input, shape index: {}]   ;;  %s1974_s6 = inlined_call_operand.<no memory space> [shape: f32[1], index: 6, kind: input, shape index: {}]   ;;  %s1975_s7 = inlined_call_operand.vmem [shape: f32[2,12,256], index: 7, kind: output, shape index: {}]  }
   0x1   :  { %12 = sst [smem:[#allocation2]] %s1974_s6 }
   0x2   :  { %13 = vsyncpa [#allocation4], 0 }
   0x3   :  { %14 = vsyncpa [#allocation6], 0 }
   0x4   :  { %15 = vsyncpa [#allocation9], 0  ;;  %s1400_s26 = smov 0   ;;  %s1402_s27 = smov 0  }
   0x5   :  { %s1404_s28 = smov 0  }
   0x6 LB: > { %s251_s30 = sshll.u32 %s1971_s3, 4  ;;  %s1045_s8 = sadd.s32 4294967295, %s1351_s28   ;;  %s1351_s28 = sphi %s1404_s28, %s21_s28   ;;  %s1347_s27 = sphi %s1402_s27, %s1986_s27   ;;  %s1343_s26 = sphi %s1400_s26, %s1985_s26   ;;  %s252_s30 = int_to_ptr.vmem [resolvable:$true] %s251_s30 }
   0x7   : > { %p1047_p0 = scmp.ge.s32.totalorder %s1351_s28, 1  ;;  %p227_p1 = scmp.lt.s32.totalorder %s1351_s28, 3 }
   0x8   : > { %p1421_p2 = scmp.eq.s32.totalorder %s1045_s8, 0  ;;  %s33_s11 = sadd.s32 1, %s1347_s27 }
   0x9   : > { %p1425_p3 = pnand %p1047_p0, %p227_p1  ;;  %s240_s14 = sshll.u32 %s1970_s2, 4  ;;  %s241_s14 = int_to_ptr.vmem [resolvable:$true] %s240_s14 }
   0xa   : > { %s1979_s9 = scalar_select %p1421_p2, 1, 0 }
   0xb   : > { %s1980_s10 = scalar_select %p1425_p3, 1, 0 }
   0xc   : > { %p1204_p4 = pneg %p1425_p3  ;;  %p1441_p6 = scmp.ge.s32.totalorder %s33_s11, 2 }
   0xd   : > { %s262_s19 = sshll.u32 %s1972_s4, 4  ;;  %s1257_s20 = scalar_lea.vmem %s252_s30, 128  ;;  %s263_s19 = int_to_ptr.vmem [resolvable:$true] %s262_s19 }
   0xe   : > { %p1437_p5 = pnand %p1421_p2, %p1204_p4  ;;  %p1258_p7 = scmp.ne.s32.totalorder %s252_s30, %s1257_s20 }
   0xf   : > { %p1265_p11 = scmp.lt.s32.totalorder %s252_s30, %s252_s30  ;;  %p1266_p12 = scmp.lt.s32.totalorder %s1257_s20, %s1257_s20 }
  0x10   : > { %p1259_p8 = pneg %p1437_p5 }
  0x11   : > { %p1267_p13 = por %p1266_p12, %p1265_p11 }
  0x12   : > { %p1260_p9 = pnand %p1259_p8, %p1258_p7 }
  0x14   : > { %p1261_p10 = pneg %p1260_p9 }
  0x16   : > { %p1268_p0 = pnand %p1267_p13, %p1261_p10 }
  0x18   : > { %1271 = shalt.err (!%p1268_p0)
}
  0x19   : > { %s1353_s21 = smov [#allocation5]   ;;  %s1988_s11 = smov (%p1441_p6, %s33_s11), 0 }
  0x1a   : > { %1210 = dma.vmem_to_smem (!%p1437_p5), %s252_s30, 128, %s1353_s21, [#allocation6]  }
  0x1b   : > { %s1272_s22 = scalar_lea.vmem %s241_s14, 128  ;;  %p1280_p9 = scmp.lt.s32.totalorder %s241_s14, %s241_s14 }
  0x1c   : > { %p1273_p1 = scmp.ne.s32.totalorder %s241_s14, %s1272_s22  ;;  %p1281_p2 = scmp.lt.s32.totalorder %s1272_s22, %s1272_s22 }
  0x1e   : > { %p1275_p4 = pnand %p1273_p1, %p1259_p8  ;;  %p1282_p11 = por %p1281_p2, %p1280_p9 }
  0x20   : > { %p1276_p7 = pneg %p1275_p4 }
  0x22   : > { %p1283_p10 = pnand %p1282_p11, %p1276_p7 }
  0x24   : > { %1286 = shalt.err (!%p1283_p10)
}
  0x25   : > { %s1354_s23 = smov [#allocation3]   ;;  %s1287_s24 = scalar_lea.vmem %s263_s19, 16 }
  0x26   : > { %1207 = dma.vmem_to_smem (!%p1437_p5), %s241_s14, 128, %s1354_s23, [#allocation4]  }
  0x27   : > { %p1288_p6 = scmp.ne.s32.totalorder %s263_s19, %s1287_s24  ;;  %p1295_p0 = scmp.lt.s32.totalorder %s263_s19, %s263_s19 }
  0x28   : > { %p1296_p1 = scmp.lt.s32.totalorder %s1287_s24, %s1287_s24 }
  0x29   : > { %p1290_p12 = pnand %p1288_p6, %p1259_p8 }
  0x2a   : > { %p1297_p4 = por %p1296_p1, %p1295_p0 }
  0x2b   : > { %p1291_p13 = pneg %p1290_p12 }
  0x2d   : > { %p1298_p3 = pnand %p1297_p4, %p1291_p13 }
  0x2f   : > { %1301 = shalt.err (!%p1298_p3)
}
  0x30   : > { %s1355_s25 = smov [#allocation7]   ;;  %s273_s30 = sshll.u32 %s1973_s5, 4  ;;  %s274_s30 = int_to_ptr.vmem [resolvable:$true] %s273_s30 }
  0x31   : > { %1213 = dma.vmem_to_smem (!%p1437_p5), %s263_s19, 16, %s1355_s25, [#allocation6]  }
  0x32   : > { %s1302_s8 = scalar_lea.vmem %s274_s30, 16  ;;  %p1310_p11 = scmp.lt.s32.totalorder %s274_s30, %s274_s30 }
  0x33   : > { %p1303_p2 = scmp.ne.s32.totalorder %s274_s30, %s1302_s8  ;;  %p1311_p10 = scmp.lt.s32.totalorder %s1302_s8, %s1302_s8 }
  0x35   : > { %p1305_p7 = pnand %p1303_p2, %p1259_p8  ;;  %p1312_p6 = por %p1311_p10, %p1310_p11 }
  0x37   : > { %p1306_p9 = pneg %p1305_p7 }
  0x39   : > { %p1313_p3 = pnand %p1312_p6, %p1306_p9 }
  0x3b   : > { %1316 = shalt.err (!%p1313_p3)
}
  0x3c   : > { %s1356_s12 = smov [#allocation8]   ;;  %p1983_p12 = scmp.ne.s32.totalorder %s1980_s10, 0 }
  0x3d   : > { %1216 = dma.vmem_to_smem (!%p1437_p5), %s274_s30, 16, %s1356_s12, [#allocation9]  }
  0x3e   : > { %315 = sbr.rel (%p1983_p12) target bundleno = 218 (0xda), region = 48  ;;  %p1984_p13 = scmp.ne.s32.totalorder (!%p1983_p12), %s1979_s9, 0 }
  0x45   : > { %1330 = dma.done.wait (%p1984_p13), [#allocation4], 128  }
  0x46   : > { %1332 = vsyncadd (%p1984_p13), [#allocation4], 4294967168 }
  0x47   : > { %1334 = dma.done.wait (%p1984_p13), [#allocation6], 144  }
  0x48   : > { %1336 = vsyncadd (%p1984_p13), [#allocation6], 4294967152 }
  0x49   : > { %1338 = dma.done.wait (%p1984_p13), [#allocation9], 16  }
  0x4a   : > { %1340 = vsyncadd (%p1984_p13), [#allocation9], 4294967280 }
  0x4b   : > { %333 = sfence }
  0x4c   : > { %p378_p5 = scmp.lt.s32.totalorder %s1343_s26, 1  ;;  %s414_s10 = sld [smem:[#allocation7]] }
  0x4d   : > { %s416_s13 = sld [smem:[#allocation3]]  ;;  %s1064_s14 = sld [smem:[#allocation3 + $0x1]] }
  0x4e   : > { %s1990_s26 = smov (!%p378_p5, %s1343_s26), 1  ;;  %s1066_s15 = sld [smem:[#allocation3 + $0x2]] }
  0x4f   : > { %s1185_s16 = sshll.u32 %s1990_s26, 4  ;;  %s1186_s17 = sshll.u32 %s1990_s26, 3 }
  0x50   : > { %s1496_s20 = scalar_lea.vmem %s1968_s0, %s1185_s16  ;;  %s1501_s9 = scalar_lea.vmem %s1969_s1, %s1186_s17 }
  0x51   : > { %s1187_s23 = sshll.u32 %s1990_s26, 5  ;;  %v407_v0 = vld [vmem:[%s1496_s20] sm:$0xff]  ;;  %v408_v1 = vld [vmem:[%s1496_s20 + $0x8] sm:$0xff]  ;;  %s1068_s24 = sld [smem:[#allocation3 + $0x3]] }
  0x52   : > { %s1508_s29 = scalar_lea.vmem %s1975_s7, %s1187_s23  ;;  %v415_v2 = vstv %s414_s10  ;;  %v1511_v3 = vld [vmem:[%s1501_s9] ss:$4 sm:$0x3]  ;;  %v1514_v5 = vld [vmem:[%s1501_s9 + $0x1] ss:$4 sm:$0x3] }
  0x53   : > { %v418_v4 = vstv %s416_s13  ;;  %409 = vst [vmem:[%s1508_s29] sm:$0xff] %v407_v0  ;;  %410 = vst [vmem:[%s1508_s29 + $0x8] sm:$0xff] %v408_v1  ;;  %v1520_v7 = vld [vmem:[%s1501_s9 + $0x2] ss:$4 sm:$0x3]  ;;  %s439_s26 = sld [smem:[#allocation5]]  ;;  %s1070_s30 = sld [smem:[#allocation5 + $0x1]] }
  0x54   : > { %v419_v6 = vmul.f32 %v418_v4, %v1511_v3  ;;  %v424_v8 = vstv %s1064_s14  ;;  %v430_v9 = vstv %s1066_s15  ;;  %v1525_v13 = vld [vmem:[%s1501_s9 + $0x3] ss:$4 sm:$0x3]  ;;  %s1072_s8 = sld [smem:[#allocation5 + $0x2]]  ;;  %s1074_s12 = sld [smem:[#allocation5 + $0x3]] }
  0x55   : > { %v425_v11 = vmul.f32 %v1514_v5, %v424_v8  ;;  %v431_v12 = vmul.f32 %v1520_v7, %v430_v9  ;;  %v1529_v17 = vld [vmem:[%s1496_s20] ss:$8 sm:$0x3]  ;;  %s1531_s10 = sld [smem:[#allocation5 + $0x4]]  ;;  %s1078_s13 = sld [smem:[#allocation5 + $0x5]] }
  0x56   : > { %v420_v10 = vadd.f32 %v419_v6, %v415_v2  ;;  %v1534_v19 = vld [vmem:[%s1496_s20 + $0x1] ss:$8 sm:$0x3]  ;;  %v1537_v21 = vld [vmem:[%s1496_s20 + $0x2] ss:$8 sm:$0x3] }
  0x57   : > { %v436_v15 = vstv %s1068_s24  ;;  %v1541_v25 = vld [vmem:[%s1496_s20 + $0x3] ss:$8 sm:$0x3]  ;;  %s1543_s14 = sld [smem:[#allocation5 + $0x6]]  ;;  %s1549_s15 = sld [smem:[#allocation5 + $0x7]] }
  0x58   : > { %v426_v14 = vadd.f32 %v425_v11, %v420_v10  ;;  %v437_v16 = vmul.f32 %v1525_v13, %v436_v15  ;;  %v1547_v28 = vld [vmem:[%s1496_s20 + $0x4] ss:$8 sm:$0x3]  ;;  %s1551_s16 = sld [smem:[#allocation7 + $0x1]]  ;;  %s1085_s17 = sld [smem:[#allocation3 + $0x80]] }
  0x59   : > { %v441_v20 = vstv %s439_s26  ;;  %v447_v24 = vstv %s1070_s30  ;;  %v1555_v32 = vld [vmem:[%s1496_s20 + $0x5] ss:$8 sm:$0x3]  ;;  %s1086_s18 = sld [smem:[#allocation3 + $0x81]]  ;;  %s1558_s19 = sld [smem:[#allocation3 + $0x82]] }
  0x5a   : > { %v432_v18 = vadd.f32 %v431_v12, %v426_v14  ;;  %v442_v23 = vmul.f32 %v441_v20, %v1529_v17  ;;  %v448_v26 = vmul.f32 %v1534_v19, %v447_v24  ;;  %v453_v27 = vstv %s1072_s8  ;;  %s1560_s21 = sld [smem:[#allocation3 + $0x83]]  ;;  %s1563_s22 = sld [smem:[#allocation5 + $0x80]]  ;;  %v1570_v40 = vld [vmem:[%s1496_s20 + $0x6] ss:$8 sm:$0x3] }
  0x5b   : > { %v454_v30 = vmul.f32 %v1537_v21, %v453_v27  ;;  %v459_v31 = vstv %s1074_s12  ;;  %v465_v33 = vstv %s1531_s10  ;;  %v471_v36 = vstv %s1078_s13  ;;  %s1565_s23 = sld [smem:[#allocation5 + $0x81]]  ;;  %s1572_s24 = sld [smem:[#allocation5 + $0x82]]  ;;  %v1593_v51 = vld [vmem:[%s1496_s20 + $0x7] ss:$8 sm:$0x3] }
  0x5c   : > { %v438_v22 = vadd.f32 %v437_v16, %v432_v18  ;;  %v460_v35 = vmul.f32 %v1541_v25, %v459_v31  ;;  %v466_v38 = vmul.f32 %v1547_v28, %v465_v33  ;;  %v472_v39 = vmul.f32 %v1555_v32, %v471_v36  ;;  %s1575_s25 = sld [smem:[#allocation5 + $0x83]]  ;;  %s1577_s6 = sld [smem:[#allocation7 + $0x2]] }
  0x5d   : > { %v477_v45 = vstv %s1543_s14  ;;  %s1583_s26 = sld [smem:[#allocation3 + $0x100]]  ;;  %s1585_s30 = sld [smem:[#allocation3 + $0x101]]  ;;  %v483_v52 = vstv %s1549_s15 }
  0x5e   : > { %v443_v29 = vadd.f32 %v442_v23, %v438_v22  ;;  %v492_v42 = vstv %s1551_s16  ;;  %v494_v43 = vstv %s1085_s17  ;;  %s1588_s8 = sld [smem:[#allocation3 + $0x102]]  ;;  %s1590_s12 = sld [smem:[#allocation3 + $0x103]]  ;;  %v478_v56 = vmul.f32 %v1570_v40, %v477_v45 }
  0x5f   : > { %v498_v44 = vstv %s1086_s18  ;;  %v495_v46 = vmul.f32 %v494_v43, %v1511_v3  ;;  %v502_v48 = vstv %s1558_s19  ;;  %s1597_s10 = sld [smem:[#allocation5 + $0x84]]  ;;  %s1602_s13 = sld [smem:[#allocation5 + $0x85]]  ;;  %v484_v61 = vmul.f32 %v1593_v51, %v483_v52 }
  0x60   : > { %v449_v34 = vadd.f32 %v448_v26, %v443_v29  ;;  %v499_v47 = vmul.f32 %v1514_v5, %v498_v44  ;;  %v506_v50 = vstv %s1560_s21  ;;  %v503_v54 = vmul.f32 %v1520_v7, %v502_v48  ;;  %s1604_s14 = sld [smem:[#allocation5 + $0x100]]  ;;  %s1607_s20 = sld [smem:[#allocation5 + $0x101]] }
  0x61   : > { %v496_v53 = vadd.f32 %v495_v46, %v492_v42  ;;  %v510_v57 = vstv %s1563_s22  ;;  %v514_v58 = vstv %s1565_s23  ;;  %v507_v60 = vmul.f32 %v1525_v13, %v506_v50  ;;  %s1610_s15 = sld [smem:[#allocation8]]  ;;  %s1612_s16 = sld [smem:[#allocation5 + $0x102]] }
  0x62   : > { %v455_v37 = vadd.f32 %v454_v30, %v449_v34  ;;  %v511_v63 = vmul.f32 %v510_v57, %v1529_v17  ;;  %v515_v0 = vmul.f32 %v1534_v19, %v514_v58  ;;  %v518_v1 = vstv %s1572_s24  ;;  %s1618_s17 = sld [smem:[#allocation5 + $0x86]]  ;;  %s1622_s18 = sld [smem:[#allocation5 + $0x103]] }
  0x63   : > { %v500_v59 = vadd.f32 %v499_v47, %v496_v53  ;;  %v522_v4 = vstv %s1575_s25  ;;  %v547_v6 = vstv %s1577_s6  ;;  %v549_v8 = vstv %s1583_s26  ;;  %s1627_s19 = sld [smem:[#allocation7 + $0x3]]  ;;  %s1629_s21 = sld [smem:[#allocation3 + $0x180]] }
  0x64   : > { %v461_v41 = vadd.f32 %v460_v35, %v455_v37  ;;  %v550_v10 = vmul.f32 %v549_v8, %v1511_v3  ;;  %v553_v11 = vstv %s1585_s30  ;;  %v557_v12 = vstv %s1588_s8  ;;  %s1634_s22 = sld [smem:[#allocation3 + $0x181]]  ;;  %s1636_s23 = sld [smem:[#allocation3 + $0x182]] }
  0x65   : > { %v504_v62 = vadd.f32 %v503_v54, %v500_v59  ;;  %v519_v14 = vmul.f32 %v1537_v21, %v518_v1  ;;  %v554_v15 = vmul.f32 %v1514_v5, %v553_v11  ;;  %v561_v16 = vstv %s1590_s12  ;;  %s1640_s24 = sld [smem:[#allocation2]]  ;;  %s1645_s25 = sld [smem:[#allocation3 + $0x183]] }
  0x66   : > { %v467_v49 = vadd.f32 %v466_v38, %v461_v41  ;;  %v523_v20 = vmul.f32 %v1541_v25, %v522_v4  ;;  %v551_v22 = vadd.f32 %v550_v10, %v547_v6  ;;  %v558_v23 = vmul.f32 %v1520_v7, %v557_v12  ;;  %s1647_s6 = sld [smem:[#allocation5 + $0x87]]  ;;  %s1653_s26 = sld [smem:[#allocation5 + $0x104]] }
  0x67   : > { %v508_v9 = vadd.f32 %v507_v60, %v504_v62  ;;  %v526_v26 = vstv %s1597_s10  ;;  %v530_v27 = vstv %s1602_s13  ;;  %v565_v29 = vstv %s1604_s14  ;;  %s1655_s30 = sld [smem:[#allocation5 + $0x180]]  ;;  %s1662_s8 = sld [smem:[#allocation5 + $0x105]] }
  0x68   : > { %v473_v55 = vadd.f32 %v472_v39, %v467_v49  ;;  %v555_v31 = vadd.f32 %v554_v15, %v551_v22  ;;  %v562_v33 = vmul.f32 %v1525_v13, %v561_v16  ;;  %v569_v34 = vstv %s1607_s20  ;;  %s1664_s12 = sld [smem:[#allocation5 + $0x181]]  ;;  %s1676_s13 = sld [smem:[#allocation7 + $0x4]] }
  0x69   : > { %v512_v18 = vadd.f32 %v511_v63, %v508_v9  ;;  %v488_v35 = vstv %s1610_s15  ;;  %v573_v36 = vstv %s1612_s16  ;;  %v527_v38 = vmul.f32 %v1547_v28, %v526_v26  ;;  %s1666_s10 = sld [smem:[#allocation8 + $0x1]]  ;;  %s1678_s14 = sld [smem:[#allocation3 + $0x200]] }
  0x6a   : > { %v479_v2 = vadd.f32 %v478_v56, %v473_v55  ;;  %v559_v39 = vadd.f32 %v558_v23, %v555_v31  ;;  %v566_v41 = vmul.f32 %v565_v29, %v1529_v17  ;;  %v531_v43 = vmul.f32 %v1555_v32, %v530_v27  ;;  %s1683_s20 = sld [smem:[#allocation3 + $0x201]]  ;;  %s1685_s15 = sld [smem:[#allocation3 + $0x202]] }
  0x6b   : > { %v516_v30 = vadd.f32 %v515_v0, %v512_v18  ;;  %v534_v44 = vstv %s1618_s17  ;;  %v570_v45 = vmul.f32 %v1534_v19, %v569_v34  ;;  %v574_v48 = vmul.f32 %v1537_v21, %v573_v36  ;;  %s1688_s16 = sld [smem:[#allocation5 + $0x106]]  ;;  %s1691_s17 = sld [smem:[#allocation5 + $0x182]] }
  0x6c   : > { %v485_v24 = vadd.f32 %v484_v61, %v479_v2  ;;  %v563_v47 = vadd.f32 %v562_v33, %v559_v39  ;;  %v577_v49 = vstv %s1622_s18  ;;  %v602_v50 = vstv %s1627_s19  ;;  %s1695_s18 = sld [smem:[#allocation5 + $0x107]]  ;;  %s1698_s19 = sld [smem:[#allocation3 + $0x203]] }
  0x6d   : > { %v520_v37 = vadd.f32 %v519_v14, %v516_v30  ;;  %v604_v52 = vstv %s1629_s21  ;;  %v608_v53 = vstv %s1634_s22  ;;  %v612_v54 = vstv %s1636_s23  ;;  %s1700_s21 = sld [smem:[#allocation8 + $0x2]]  ;;  %s1705_s22 = sld [smem:[#allocation5 + $0x183]] }
  0x6e   : > { %v487_v42 = vmax.f32 %v485_v24, 0.0  ;;  %v567_v56 = vadd.f32 %v566_v41, %v563_v47  ;;  %v605_v57 = vmul.f32 %v604_v52, %v1511_v3  ;;  %v609_v58 = vmul.f32 %v1514_v5, %v608_v53  ;;  %s1707_s23 = sld [smem:[#allocation5 + $0x200]] }
  0x6f   : > { %v524_v46 = vadd.f32 %v523_v20, %v520_v37  ;;  %v413_v59 = vstv %s1640_s24  ;;  %v535_v60 = vmul.f32 %v1570_v40, %v534_v44  ;;  %v616_v61 = vstv %s1645_s25  ;;  %s1711_s24 = sld [smem:[#allocation5 + $0x184]]  ;;  %s1713_s25 = sld [smem:[#allocation5 + $0x185]] }
  0x70   : > { %v538_v62 = vstv %s1647_s6  ;;  %v571_v63 = vadd.f32 %v570_v45, %v567_v56  ;;  %v606_v0 = vadd.f32 %v605_v57, %v602_v50  ;;  %v613_v1 = vmul.f32 %v1520_v7, %v612_v54  ;;  %s1719_s6 = sld [smem:[#allocation5 + $0x186]] }
  0x71   : > { %v528_v55 = vadd.f32 %v527_v38, %v524_v46  ;;  %v489_v2 = vmul.f32 %v488_v35, %v487_v42  ;;  %v578_v4 = vmul.f32 %v1541_v25, %v577_v49  ;;  %v581_v6 = vstv %s1653_s26  ;;  %s1721_s26 = sld [smem:[#allocation5 + $0x201]] }
  0x72   : > { %v620_v8 = vstv %s1655_s30  ;;  %v575_v10 = vadd.f32 %v574_v48, %v571_v63  ;;  %v610_v11 = vadd.f32 %v609_v58, %v606_v0  ;;  %v617_v12 = vmul.f32 %v1525_v13, %v616_v61  ;;  %s1729_s30 = sld [smem:[#allocation5 + $0x202]] }
  0x73   : > { %v532_v9 = vadd.f32 %v531_v43, %v528_v55  ;;  %v585_v14 = vstv %s1662_s8  ;;  %v624_v15 = vstv %s1664_s12  ;;  %v543_v16 = vstv %s1666_s10  ;;  %s1734_s8 = sld [smem:[#allocation5 + $0x203]]  ;;  %s1739_s12 = sld [smem:[#allocation7 + $0x5]] }
  0x74   : > { %v614_v18 = vadd.f32 %v613_v1, %v610_v11  ;;  %v621_v20 = vmul.f32 %v620_v8, %v1529_v17  ;;  %v1715_v22 = vadd.f32 %v489_v2, %v413_v59  ;;  %v539_v23 = vmul.f32 %v1593_v51, %v538_v62  ;;  %s1800_s10 = sld [smem:[#allocation3 + $0x300]] }
  0x75   : > { %v579_v24 = vadd.f32 %v578_v4, %v575_v10  ;;  %v582_v26 = vmul.f32 %v1547_v28, %v581_v6  ;;  %v536_v27 = vadd.f32 %v535_v60, %v532_v9  ;;  %v586_v29 = vmul.f32 %v1555_v32, %v585_v14 }
  0x76   : > { %v618_v30 = vadd.f32 %v617_v12, %v614_v18  ;;  %v625_v31 = vmul.f32 %v1534_v19, %v624_v15  ;;  %v657_v33 = vstv %s1676_s13  ;;  %v659_v34 = vstv %s1678_s14  ;;  %s1741_s13 = sld [smem:[#allocation3 + $0x280]]  ;;  %s1745_s14 = sld [smem:[#allocation3 + $0x281]] }
  0x77   : > { %v663_v35 = vstv %s1683_s20  ;;  %v667_v36 = vstv %s1685_s15  ;;  %v589_v37 = vstv %s1688_s16  ;;  %v628_v39 = vstv %s1691_s17  ;;  %s1750_s20 = sld [smem:[#allocation3 + $0x282]]  ;;  %s1752_s15 = sld [smem:[#allocation3 + $0x283]] }
  0x78   : > { %v622_v38 = vadd.f32 %v621_v20, %v618_v30  ;;  %v660_v41 = vmul.f32 %v659_v34, %v1511_v3  ;;  %v583_v42 = vadd.f32 %v582_v26, %v579_v24  ;;  %v593_v43 = vstv %s1695_s18  ;;  %s1760_s16 = sld [smem:[#allocation5 + $0x204]]  ;;  %s1762_s17 = sld [smem:[#allocation5 + $0x280]] }
  0x79   : > { %v664_v44 = vmul.f32 %v1514_v5, %v663_v35  ;;  %v671_v45 = vstv %s1698_s19  ;;  %v540_v46 = vadd.f32 %v539_v23, %v536_v27  ;;  %v598_v47 = vstv %s1700_s21  ;;  %s1765_s18 = sld [smem:[#allocation5 + $0x187]]  ;;  %s1767_s19 = sld [smem:[#allocation8 + $0x3]] }
  0x7a   : > { %v661_v48 = vadd.f32 %v660_v41, %v657_v33  ;;  %v668_v49 = vmul.f32 %v1520_v7, %v667_v36  ;;  %v590_v50 = vmul.f32 %v1570_v40, %v589_v37  ;;  %v626_v52 = vadd.f32 %v625_v31, %v622_v38  ;;  %s1896_s21 = sld [smem:[#allocation5 + $0x307]] }
  0x7b   : > { %v629_v53 = vmul.f32 %v1537_v21, %v628_v39  ;;  %v675_v54 = vstv %s1707_s23  ;;  %v632_v55 = vstv %s1705_s22  ;;  %v636_v56 = vstv %s1711_s24  ;;  %s1773_s22 = sld [smem:[#allocation5 + $0x205]]  ;;  %s1775_s23 = sld [smem:[#allocation5 + $0x281]] }
  0x7c   : > { %v665_v57 = vadd.f32 %v664_v44, %v661_v48  ;;  %v672_v58 = vmul.f32 %v1525_v13, %v671_v45  ;;  %v587_v59 = vadd.f32 %v586_v29, %v583_v42  ;;  %v640_v60 = vstv %s1713_s25  ;;  %s1785_s24 = sld [smem:[#allocation5 + $0x282]]  ;;  %s1790_s25 = sld [smem:[#allocation5 + $0x206]] }
  0x7d   : > { %v644_v61 = vstv %s1719_s6  ;;  %v679_v62 = vstv %s1721_s26  ;;  %v542_v63 = vmax.f32 %v540_v46, 0.0  ;;  %v594_v0 = vmul.f32 %v1593_v51, %v593_v43  ;;  %s1792_s6 = sld [smem:[#allocation5 + $0x207]]  ;;  %s1798_s26 = sld [smem:[#allocation5 + $0x283]] }
  0x7e   : > { %v669_v1 = vadd.f32 %v668_v49, %v665_v57  ;;  %v676_v2 = vmul.f32 %v675_v54, %v1529_v17  ;;  %v630_v4 = vadd.f32 %v629_v53, %v626_v52  ;;  %v633_v6 = vmul.f32 %v1541_v25, %v632_v55 }
  0x7f   : > { %v637_v8 = vmul.f32 %v1547_v28, %v636_v56  ;;  %v683_v9 = vstv %s1729_s30  ;;  %v641_v10 = vmul.f32 %v1555_v32, %v640_v60  ;;  %v1779_v11 = vmul.f32 %v1570_v40, %v644_v61  ;;  %s1804_s30 = sld [smem:[#allocation5 + $0x284]] }
  0x80   : > { %v673_v12 = vadd.f32 %v672_v58, %v669_v1  ;;  %v680_v14 = vmul.f32 %v1534_v19, %v679_v62  ;;  %v591_v15 = vadd.f32 %v590_v50, %v587_v59  ;;  %v687_v18 = vstv %s1734_s8  ;;  %s1806_s8 = sld [smem:[#allocation7 + $0x6]] }
  0x81   : > { %v712_v20 = vstv %s1739_s12  ;;  %v714_v23 = vstv %s1741_s13  ;;  %v544_v24 = vmul.f32 %v543_v16, %v542_v63  ;;  %v684_v27 = vmul.f32 %v1537_v21, %v683_v9  ;;  %s1813_s12 = sld [smem:[#allocation3 + $0x301]]  ;;  %s1815_s13 = sld [smem:[#allocation3 + $0x302]] }
  0x82   : > { %v677_v26 = vadd.f32 %v676_v2, %v673_v12  ;;  %v715_v29 = vmul.f32 %v714_v23, %v1511_v3  ;;  %v634_v30 = vadd.f32 %v633_v6, %v630_v4  ;;  %v718_v31 = vstv %s1745_s14  ;;  %s1819_s14 = sld [smem:[#allocation3 + $0x303]] }
  0x83   : > { %v722_v33 = vstv %s1750_s20  ;;  %v726_v34 = vstv %s1752_s15  ;;  %v688_v35 = vmul.f32 %v1541_v25, %v687_v18  ;;  %v719_v37 = vmul.f32 %v1514_v5, %v718_v31  ;;  %s1826_s20 = sld [smem:[#allocation5 + $0x285]]  ;;  %s1828_s15 = sld [smem:[#allocation5 + $0x300]] }
  0x84   : > { %v681_v16 = vadd.f32 %v680_v14, %v677_v26  ;;  %v716_v36 = vadd.f32 %v715_v29, %v712_v20  ;;  %v1808_v38 = vadd.f32 %v594_v0, %v591_v15  ;;  %v691_v39 = vstv %s1760_s16  ;;  %s1836_s16 = sld [smem:[#allocation5 + $0x286]] }
  0x85   : > { %v723_v41 = vmul.f32 %v1520_v7, %v722_v33  ;;  %v730_v42 = vstv %s1762_s17  ;;  %v648_v43 = vstv %s1765_s18  ;;  %v727_v46 = vmul.f32 %v1525_v13, %v726_v34  ;;  %s1841_s17 = sld [smem:[#allocation5 + $0x301]]  ;;  %s1846_s18 = sld [smem:[#allocation5 + $0x302]] }
  0x86   : > { %v685_v44 = vadd.f32 %v684_v27, %v681_v16  ;;  %v720_v45 = vadd.f32 %v719_v37, %v716_v36  ;;  %v638_v48 = vadd.f32 %v637_v8, %v634_v30  ;;  %v653_v49 = vstv %s1767_s19  ;;  %s1181_s19 = sld [smem:[#allocation8 + $0x7]] }
  0x87   : > { %v695_v50 = vstv %s1773_s22  ;;  %v734_v52 = vstv %s1775_s23  ;;  %v692_v54 = vmul.f32 %v1547_v28, %v691_v39  ;;  %v731_v56 = vmul.f32 %v730_v42, %v1529_v17  ;;  %s1849_s22 = sld [smem:[#allocation5 + $0x287]]  ;;  %s1856_s23 = sld [smem:[#allocation5 + $0x303]] }
  0x88   : > { %v689_v53 = vadd.f32 %v688_v35, %v685_v44  ;;  %v724_v55 = vadd.f32 %v723_v41, %v720_v45  ;;  %v1831_v57 = vadd.f32 %v544_v24, %v1715_v22  ;;  %v597_v58 = vmax.f32 %v1808_v38, 0.0 }
  0x89   : > { %v649_v59 = vmul.f32 %v1593_v51, %v648_v43  ;;  %v738_v60 = vstv %s1785_s24  ;;  %v696_v61 = vmul.f32 %v1555_v32, %v695_v50  ;;  %v699_v62 = vstv %s1790_s25  ;;  %s1858_s24 = sld [smem:[#allocation5 + $0x304]]  ;;  %s1863_s25 = sld [smem:[#allocation7 + $0x7]] }
  0x8a   : > { %v728_v63 = vadd.f32 %v727_v46, %v724_v55  ;;  %v735_v0 = vmul.f32 %v1534_v19, %v734_v52  ;;  %v642_v22 = vadd.f32 %v641_v10, %v638_v48  ;;  %v703_v1 = vstv %s1792_s6  ;;  %s1865_s6 = sld [smem:[#allocation3 + $0x380]] }
  0x8b   : > { %v742_v2 = vstv %s1798_s26  ;;  %v769_v4 = vstv %s1800_s10  ;;  %v693_v6 = vadd.f32 %v692_v54, %v689_v53  ;;  %v739_v9 = vmul.f32 %v1537_v21, %v738_v60  ;;  %s1870_s26 = sld [smem:[#allocation3 + $0x381]]  ;;  %s1872_s10 = sld [smem:[#allocation3 + $0x382]] }
  0x8c   : > { %v732_v8 = vadd.f32 %v731_v56, %v728_v63  ;;  %v767_v12 = vstv %s1806_s8  ;;  %v746_v14 = vstv %s1804_s30  ;;  %v770_v15 = vmul.f32 %v769_v4, %v1511_v3  ;;  %s1876_s30 = sld [smem:[#allocation5 + $0x305]]  ;;  %s1878_s8 = sld [smem:[#allocation3 + $0x383]] }
  0x8d   : > { %v773_v18 = vstv %s1813_s12  ;;  %v777_v20 = vstv %s1815_s13  ;;  %v743_v23 = vmul.f32 %v1541_v25, %v742_v2  ;;  %v781_v26 = vstv %s1819_s14  ;;  %s1887_s12 = sld [smem:[#allocation5 + $0x380]]  ;;  %s1891_s13 = sld [smem:[#allocation5 + $0x306]] }
  0x8e   : > { %v736_v10 = vadd.f32 %v735_v0, %v732_v8  ;;  %v774_v24 = vmul.f32 %v1514_v5, %v773_v18  ;;  %v646_v27 = vadd.f32 %v1779_v11, %v642_v22  ;;  %v700_v29 = vmul.f32 %v1570_v40, %v699_v62  ;;  %s1898_s14 = sld [smem:[#allocation5 + $0x381]] }
  0x8f   : > { %v771_v30 = vadd.f32 %v770_v15, %v767_v12  ;;  %v778_v31 = vmul.f32 %v1520_v7, %v777_v20  ;;  %v697_v33 = vadd.f32 %v696_v61, %v693_v6  ;;  %v750_v16 = vstv %s1826_s20  ;;  %s1902_s20 = sld [smem:[#allocation8 + $0x4]] }
  0x90   : > { %v740_v34 = vadd.f32 %v739_v9, %v736_v10  ;;  %v785_v35 = vstv %s1828_s15  ;;  %v747_v11 = vmul.f32 %v1547_v28, %v746_v14  ;;  %v754_v36 = vstv %s1836_s16  ;;  %s1908_s15 = sld [smem:[#allocation5 + $0x382]]  ;;  %s1917_s16 = sld [smem:[#allocation5 + $0x383]] }
  0x91   : > { %v775_v37 = vadd.f32 %v774_v24, %v771_v30  ;;  %v782_v38 = vmul.f32 %v1525_v13, %v781_v26  ;;  %v599_v39 = vmul.f32 %v598_v47, %v597_v58  ;;  %v704_v41 = vmul.f32 %v1593_v51, %v703_v1 }
  0x92   : > { %v744_v42 = vadd.f32 %v743_v23, %v740_v34  ;;  %v789_v43 = vstv %s1841_s17  ;;  %v650_v44 = vadd.f32 %v649_v59, %v646_v27  ;;  %v786_v46 = vmul.f32 %v785_v35, %v1529_v17  ;;  %s1922_s17 = sld [smem:[#allocation5 + $0x384]] }
  0x93   : > { %v779_v45 = vadd.f32 %v778_v31, %v775_v37  ;;  %v793_v48 = vstv %s1846_s18  ;;  %v701_v50 = vadd.f32 %v700_v29, %v697_v33  ;;  %v751_v47 = vmul.f32 %v1555_v32, %v750_v16  ;;  %s1930_s18 = sld [smem:[#allocation5 + $0x385]] }
  0x94   : > { %v755_v52 = vmul.f32 %v1570_v40, %v754_v36  ;;  %v758_v53 = vstv %s1849_s22  ;;  %v748_v54 = vadd.f32 %v747_v11, %v744_v42  ;;  %v790_v56 = vmul.f32 %v1534_v19, %v789_v43  ;;  %s1935_s22 = sld [smem:[#allocation8 + $0x5]] }
  0x95   : > { %v783_v55 = vadd.f32 %v782_v38, %v779_v45  ;;  %v797_v58 = vstv %s1856_s23  ;;  %v794_v59 = vmul.f32 %v1537_v21, %v793_v48  ;;  %v801_v60 = vstv %s1858_s24  ;;  %s1938_s23 = sld [smem:[#allocation5 + $0x386]]  ;;  %s1180_s24 = sld [smem:[#allocation5 + $0x387]] }
  0x96   : > { %v822_v61 = vstv %s1863_s25  ;;  %v824_v62 = vstv %s1865_s6  ;;  %v828_v22 = vstv %s1870_s26  ;;  %v832_v1 = vstv %s1872_s10  ;;  %s1167_s25 = sld [smem:[#allocation8 + $0x6]] }
  0x97   : > { %v787_v63 = vadd.f32 %v786_v46, %v783_v55  ;;  %v825_v0 = vmul.f32 %v824_v62, %v1511_v3  ;;  %v798_v2 = vmul.f32 %v1541_v25, %v797_v58  ;;  %v805_v4 = vstv %s1876_s30 }
  0x98   : > { %v829_v6 = vmul.f32 %v1514_v5, %v828_v22  ;;  %v836_v8 = vstv %s1878_s8  ;;  %v752_v9 = vadd.f32 %v751_v47, %v748_v54  ;;  %v833_v15 = vmul.f32 %v1520_v7, %v832_v1 }
  0x99   : > { %v791_v12 = vadd.f32 %v790_v56, %v787_v63  ;;  %v826_v14 = vadd.f32 %v825_v0, %v822_v61  ;;  %v652_v18 = vmax.f32 %v650_v44, 0.0  ;;  %v705_v3 = vadd.f32 %v704_v41, %v701_v50 }
  0x9a   : > { %v759_v20 = vmul.f32 %v1593_v51, %v758_v53  ;;  %v840_v10 = vstv %s1887_s12  ;;  %v802_v23 = vmul.f32 %v1547_v28, %v801_v60  ;;  %v837_v26 = vmul.f32 %v1525_v13, %v836_v8 }
  0x9b   : > { %v795_v5 = vadd.f32 %v794_v59, %v791_v12  ;;  %v830_v24 = vadd.f32 %v829_v6, %v826_v14  ;;  %v806_v27 = vmul.f32 %v1555_v32, %v805_v4  ;;  %v809_v29 = vstv %s1891_s13 }
  0x9c   : > { %v813_v30 = vstv %s1896_s21  ;;  %v844_v7 = vstv %s1898_s14  ;;  %v756_v31 = vadd.f32 %v755_v52, %v752_v9  ;;  %v841_v16 = vmul.f32 %v840_v10, %v1529_v17 }
  0x9d   : > { %v799_v33 = vadd.f32 %v798_v2, %v795_v5  ;;  %v834_v34 = vadd.f32 %v833_v15, %v830_v24  ;;  %v600_v35 = vadd.f32 %v599_v39, %v1831_v57  ;;  %v708_v11 = vstv %s1902_s20 }
  0x9e   : > { %v848_v13 = vstv %s1908_s15  ;;  %v810_v37 = vmul.f32 %v1570_v40, %v809_v29  ;;  %v845_v41 = vmul.f32 %v1534_v19, %v844_v7  ;;  %v654_v42 = vmul.f32 %v653_v49, %v652_v18 }
  0x9f   : > { %v803_v36 = vadd.f32 %v802_v23, %v799_v33  ;;  %v838_v38 = vadd.f32 %v837_v26, %v834_v34  ;;  %v707_v43 = vmax.f32 %v705_v3, 0.0  ;;  %v814_v17 = vmul.f32 %v1593_v51, %v813_v30  ;;  %v411_v30 = vld [vmem:[%s1501_s9] sm:$0xff] }
  0xa0   : > { %v852_v57 = vstv %s1917_s16  ;;  %v760_v39 = vadd.f32 %v759_v20, %v756_v31  ;;  %v849_v46 = vmul.f32 %v1537_v21, %v848_v13  ;;  %v856_v48 = vstv %s1922_s17 }
  0xa1   : > { %v807_v44 = vadd.f32 %v806_v27, %v803_v36  ;;  %v842_v45 = vadd.f32 %v841_v16, %v838_v38  ;;  %v853_v19 = vmul.f32 %v1541_v25, %v852_v57  ;;  %v655_v49 = vadd.f32 %v654_v42, %v600_v35 }
  0xa2   : > { %v709_v52 = vmul.f32 %v708_v11, %v707_v43  ;;  %v860_v53 = vstv %s1930_s18  ;;  %v762_v54 = vmax.f32 %v760_v39, 0.0  ;;  %v857_v58 = vmul.f32 %v1547_v28, %v856_v48 }
  0xa3   : > { %v811_v50 = vadd.f32 %v810_v37, %v807_v44  ;;  %v846_v47 = vadd.f32 %v845_v41, %v842_v45  ;;  %v763_v59 = vstv %s1935_s22  ;;  %v864_v60 = vstv %s1938_s23 }
  0xa4   : > { %v861_v62 = vmul.f32 %v1555_v32, %v860_v53  ;;  %v710_v21 = vadd.f32 %v709_v52, %v655_v49  ;;  %v868_v63 = vstv %s1180_s24  ;;  %v764_v0 = vmul.f32 %v763_v59, %v762_v54 }
  0xa5   : > { %v815_v55 = vadd.f32 %v814_v17, %v811_v50  ;;  %v850_v56 = vadd.f32 %v849_v46, %v846_v47  ;;  %v865_v25 = vmul.f32 %v1570_v40, %v864_v60  ;;  %v818_v2 = vstv %s1167_s25 }
  0xa6   : > { %v869_v6 = vmul.f32 %v1593_v51, %v868_v63  ;;  %v765_v8 = vadd.f32 %v764_v0, %v710_v21  ;;  %v873_v14 = vstv %s1181_s19  ;;  %v883_v5 = vlaneseq }
  0xa7   : > { %v854_v61 = vadd.f32 %v853_v19, %v850_v56  ;;  %v817_v22 = vmax.f32 %v815_v55, 0.0 }
  0xa8   : > { %v884_v23 = vshrl.u32 %v883_v5, 7 }
  0xa9   : > { %v858_v1 = vadd.f32 %v857_v58, %v854_v61  ;;  %v819_v9 = vmul.f32 %v818_v2, %v817_v22 }
  0xaa   : > { %v885_v51 = vsub.s32 0, %v884_v23  ;;  %v889_v24 = vsub.s32 1, %v884_v23 }
  0xab   : > { %v862_v4 = vadd.f32 %v861_v62, %v858_v1  ;;  %v820_v15 = vadd.f32 %v819_v9, %v765_v8 }
  0xad   : > { %v866_v28 = vadd.f32 %v865_v25, %v862_v4 }
  0xaf   : > { %v870_v12 = vadd.f32 %v869_v6, %v866_v28 }
  0xb1   : > { %v872_v32 = vmax.f32 %v870_v12, 0.0 }
  0xb3   : > { %v874_v18 = vmul.f32 %v873_v14, %v872_v32 }
  0xb5   : > { %v875_v3 = vadd.f32 %v874_v18, %v820_v15 }
  0xb7   : > { %v1182_v20 = vmul.f32 -1.442695, %v875_v3 }
  0xb9   : > { %1253 = vpow2.f32 %v1182_v20 }
  0xc3   : > { %v1254_v10 = vpop.eup %1253 }
  0xc4   : > { %v879_v40 = vadd.f32 1.0, %v1254_v10 }
  0xc6   : > { %1255 = vrcp.f32 %v879_v40 }
  0xd0   : > { %v1256_v26 = vpop.eup %1255 }
  0xd1   : > { %v886_v27 = vrot.slane %v1256_v26, %v885_v51  ;;  %v890_v29 = vrot.slane %v1256_v26, %v889_v24 }
  0xd3   : > { %v891_v7 = vcombine.low %v886_v27, %v890_v29 }
  0xd5   : > { %v893_v31 = vmul.f32 %v891_v7, %v411_v30 }
  0xd7   : > { %v895_v33 = vcombine.high %v893_v31, %v893_v31  ;;  %897 = vst [vmem:[%s1508_s29 + $0x10] sm:$0xf] %v893_v31 }
  0xd9   : > { %898 = vst [vmem:[%s1508_s29 + $0x18] sm:$0xf] %v895_v33 }
  0xda PF: > { %s21_s28 = sadd.s32 1, %s1351_s28   ;;  %s1985_s26 = smov %s1347_s27 }
  0xdb   : > { %p18_p8 = scmp.ge.s32.totalorder %s21_s28, 4   ;;  %s1986_s27 = smov %s1988_s11 }
  0xdd   :  { %20 = sbr.rel (!%p18_p8) target bundleno = 6 (0x6), region = 108 }
  0xe4   :  { %929 = vsyncpa [#allocation4], 1 }
  0xe5   :  { %931 = vsyncpa [#allocation4 + $0x1], 1 }
  0xe6   :  { %932 = vsyncpa [#allocation6], 1 }
  0xe7   :  { %933 = vsyncpa [#allocation9], 1 }

</bundles_post_ra>
